<compile_context>
chip_gen: v7x
topology: tpu7x:2x2x1
jax: 0.10.0
libtpu: 0.0.40
codegen_flags: <defaults>
</compile_context>

<pallas_src>
import functools

import numpy as np
import jax
import jax.numpy as jnp
from jax.experimental import pallas as pl
from jax.experimental.pallas import tpu as pltpu


def _round_up(v, m):
    return (v + m - 1) // m * m


def _fused_kernel(p1_ref, w1_ref, b1_ref, w2_ref, b2_ref, w3_ref, b3_ref, o_ref,
                  *, kk, p2n, npad, c1, c2, feat, n_out):
    """Whole forward pass; all loops are static and unrolled at trace time.

    p1_ref: (kk*p2n*npad, K1) bf16  conv1 im2col rows, ordered (k2, p2, n)
    w1_ref: (K1, c1)          bf16  conv1 weight, rows (c_in, kh, kw)
    w2_ref: (kk*c1, c2)       bf16  conv2 weight, one (c1, c2) slab per offset
    w3_ref: (p2n*c2, feat)    bf16  flatten+linear weight, one slab per spatial pos
    b*_ref: f32 biases;  o_ref: (n_out, feat) f32
    """
    blk = p2n * npad
    bf16 = jnp.bfloat16

    # --- conv1 (single hoisted matmul over all duplicated rows) + ReLU -------
    a1 = jnp.dot(p1_ref[...], w1_ref[...], preferred_element_type=jnp.float32)
    a1 = jnp.maximum(a1 + b1_ref[...], 0.0)                  # (kk*blk, c1) f32

    # --- conv2: accumulate one (blk,c1)x(c1,c2) matmul per kernel offset -----
    # Each a1 slab is an 8-aligned f32 tile view; cast to bf16 only for the MXU.
    acc2 = jnp.zeros((blk, c2), jnp.float32)
    for k2 in range(kk):
        a1_blk = a1[k2 * blk:(k2 + 1) * blk, :].astype(bf16)
        w2_blk = w2_ref[pl.ds(k2 * c1, c1), :]
        acc2 = acc2 + jnp.dot(a1_blk, w2_blk, preferred_element_type=jnp.float32)
    a2 = jnp.maximum(acc2 + b2_ref[...], 0.0)                # (blk, c2) f32, rows (p2, n)

    # --- Flatten (NCHW order) + Linear + ReLU --------------------------------
    # out[n, j] = sum_{p2, c2} a2[p2*npad + n, c2] * lin_w[j, c2*p2n + p2]
    acc3 = jnp.zeros((npad, feat), jnp.float32)
    for p2 in range(p2n):
        a2_blk = a2[p2 * npad:(p2 + 1) * npad, :].astype(bf16)
        w3_blk = w3_ref[pl.ds(p2 * c2, c2), :]
        acc3 = acc3 + jnp.dot(a2_blk, w3_blk, preferred_element_type=jnp.float32)
    out = jnp.maximum(acc3 + b3_ref[...], 0.0)
    o_ref[...] = out[:n_out, :]


def shared_conv_module_forward(x, conv_params, strides, lin_w, lin_b):
    """x: (N, Cin, H, W) NCHW (PyTorch). Returns (N, out_features) float32."""
    assert x.ndim == 4
    # Fused single-kernel path for the 2-conv configuration of the module.
    assert len(conv_params) == 2 and len(strides) == 2

    N, Cin, H, W = x.shape
    (w1, b1), (w2, b2) = conv_params
    s1, s2 = strides
    C1, _, k, _ = w1.shape
    C2 = w2.shape[0]
    Ho1 = (H - k) // s1 + 1
    Wo1 = (W - k) // s1 + 1
    Ho2 = (Ho1 - k) // s2 + 1
    Wo2 = (Wo1 - k) // s2 + 1
    P2 = Ho2 * Wo2
    KK = k * k
    K1 = Cin * KK
    F_out, F_in = lin_w.shape
    assert F_in == C2 * P2, "Linear in_features must equal flattened conv output"

    f32 = jnp.float32
    bf16 = jnp.bfloat16
    NPAD = max(_round_up(N, 8), 8)          # sublane-aligned batch
    BLK = P2 * NPAD
    M1 = KK * BLK

    x = x.astype(f32)

    # --- conv1 im2col on the raw input; feature order (c, kh, kw) matches
    #     PyTorch's w1.reshape(C1, -1) flattening -----------------------------
    cols = []
    for i in range(k):
        for j in range(k):
            cols.append(x[:, :, i:i + s1 * (Ho1 - 1) + 1:s1,
                          j:j + s1 * (Wo1 - 1) + 1:s1])
    pat = jnp.stack(cols, axis=2).reshape(N, K1, Ho1, Wo1)
    pat = pat.transpose(0, 2, 3, 1)                          # (N, Ho1, Wo1, K1)

    # --- duplicate/reorder conv1 patch rows so conv2's im2col is a set of
    #     contiguous 8-aligned row blocks inside the kernel --------------------
    oh1_map = np.empty((KK, P2), np.int32)
    ow1_map = np.empty((KK, P2), np.int32)
    for kh in range(k):
        for kw in range(k):
            for oh in range(Ho2):
                for ow in range(Wo2):
                    oh1_map[kh * k + kw, oh * Wo2 + ow] = s2 * oh + kh
                    ow1_map[kh * k + kw, oh * Wo2 + ow] = s2 * ow + kw
    dup = pat[:, oh1_map, ow1_map, :]                        # (N, KK, P2, K1)
    dup = jnp.transpose(dup, (1, 2, 0, 3))                   # (KK, P2, N, K1)
    dup = jnp.pad(dup, ((0, 0), (0, 0), (0, NPAD - N), (0, 0)))
    p1 = dup.reshape(M1, K1).astype(bf16)                    # compact, bf16

    # --- compact weights in the layouts the kernel consumes (PyTorch layouts
    #     folded in; bf16 MXU operands, f32 biases) ---------------------------
    w1c = w1.astype(f32).reshape(C1, K1).T.astype(bf16)                  # (K1, C1)
    b1c = b1.astype(f32).reshape(1, C1)
    w2c = jnp.transpose(w2.astype(f32), (2, 3, 1, 0)).reshape(KK * C1, C2).astype(bf16)
    b2c = b2.astype(f32).reshape(1, C2)
    # Permute Linear columns once so the internal (p2, c2) layout reproduces
    # PyTorch's NCHW flatten order (feature index = c2*P2 + p2).
    w3c = jnp.transpose(lin_w.astype(f32).reshape(F_out, C2, P2),
                        (2, 1, 0)).reshape(P2 * C2, F_out).astype(bf16)
    b3c = lin_b.astype(f32).reshape(1, F_out)

    kernel = functools.partial(
        _fused_kernel, kk=KK, p2n=P2, npad=NPAD, c1=C1, c2=C2, feat=F_out, n_out=N)

    flops = 2 * (M1 * K1 * C1 + KK * BLK * C1 * C2 + P2 * NPAD * C2 * F_out)
    bytes_accessed = (2 * (p1.size + w1c.size + w2c.size + w3c.size)
                      + 4 * (b1c.size + b2c.size + b3c.size + N * F_out))

    out = pl.pallas_call(
        kernel,
        out_shape=jax.ShapeDtypeStruct((N, F_out), f32),
        grid=(1,),
        in_specs=[
            pl.BlockSpec(p1.shape, lambda i: (0, 0)),
            pl.BlockSpec(w1c.shape, lambda i: (0, 0)),
            pl.BlockSpec(b1c.shape, lambda i: (0, 0)),
            pl.BlockSpec(w2c.shape, lambda i: (0, 0)),
            pl.BlockSpec(b2c.shape, lambda i: (0, 0)),
            pl.BlockSpec(w3c.shape, lambda i: (0, 0)),
            pl.BlockSpec(b3c.shape, lambda i: (0, 0)),
        ],
        out_specs=pl.BlockSpec((N, F_out), lambda i: (0, 0)),
        compiler_params=pltpu.CompilerParams(
            dimension_semantics=("arbitrary",)),
        cost_estimate=pl.CostEstimate(
            flops=flops, transcendentals=0, bytes_accessed=bytes_accessed),
    )(p1, w1c, b1c, w2c, b2c, w3c, b3c)
    return out


if __name__ == "__main__":
    # Module config: in_channels=4, kernel_size=3, strides=[2,2],
    # output_dims=[8, 16, 144] (last conv: 16ch * 3*3 spatial = 144 features,
    # matching Linear(in_features=output_dims[-1], out_features=output_dims[-1])).
    in_channels = 4
    kernel_size = 3
    strides = [2, 2]
    output_dims = [8, 16, 144]
    assert len(strides) == len(output_dims) - 1

    key = jax.random.PRNGKey(0)
    kx, *keys = jax.random.split(key, 9)
    x = jax.random.normal(kx, (2, in_channels, 16, 16), dtype=jnp.float32)

    # Deterministic synthetic parameters (PyTorch layouts: conv OIHW, linear [out, in]).
    conv_params = []
    prev = in_channels
    ki = 0
    for cout, s in zip(output_dims, strides):
        w = 0.1 * jax.random.normal(keys[ki], (cout, prev, kernel_size, kernel_size),
                                    jnp.float32)
        ki += 1
        b = 0.1 * jax.random.normal(keys[ki], (cout,), jnp.float32)
        ki += 1
        conv_params.append((w, b))
        prev = cout
    lin_w = 0.1 * jax.random.normal(keys[ki], (output_dims[-1], output_dims[-1]),
                                    jnp.float32)
    ki += 1
    lin_b = 0.1 * jax.random.normal(keys[ki], (output_dims[-1],), jnp.float32)

    @jax.jit
    def fwd(x, conv_params, lin_w, lin_b):
        return shared_conv_module_forward(x, conv_params, strides, lin_w, lin_b)

    out = fwd(x, conv_params, lin_w, lin_b)
    out = jax.block_until_ready(out)
    assert out.shape == (2, output_dims[-1])

    # Pure-JAX reference with the same bf16 operand rounding (accumulation in
    # f32 on both sides), so tolerances stay tight while matmul inputs are bf16.
    def rnd(a):
        return a.astype(jnp.bfloat16).astype(jnp.float32)

    ref = rnd(x)
    for (w, b), s in zip(conv_params, strides):
        ref = jax.lax.conv_general_dilated(
            ref, rnd(w), (s, s), "VALID",
            dimension_numbers=("NCHW", "OIHW", "NCHW"),
            precision=jax.lax.Precision.HIGHEST)
        ref = jnp.maximum(ref + b[None, :, None, None], 0.0)
        ref = rnd(ref)   # kernel rounds activations to bf16 before the next matmul
    ref = ref.reshape(ref.shape[0], -1)
    ref = jnp.maximum(
        jnp.dot(ref, rnd(lin_w).T, precision=jax.lax.Precision.HIGHEST) + lin_b, 0.0)
    assert jnp.allclose(out, ref, atol=1e-2, rtol=1e-2), "Pallas output mismatch vs reference"

    print("KERNEL_OK")
</pallas_src>

<mosaic_0001>
module attributes {stable_mosaic.version = 11 : i64} {
  func.func @_fused_kernel(%arg0: i32, %arg1: memref<648x36xbf16, #tpu.memory_space<vmem>>, %arg2: memref<36x8xbf16, #tpu.memory_space<vmem>>, %arg3: memref<1x8xf32, #tpu.memory_space<vmem>>, %arg4: memref<72x16xbf16, #tpu.memory_space<vmem>>, %arg5: memref<1x16xf32, #tpu.memory_space<vmem>>, %arg6: memref<144x144xbf16, #tpu.memory_space<vmem>>, %arg7: memref<1x144xf32, #tpu.memory_space<vmem>>, %arg8: memref<2x144xf32, #tpu.memory_space<vmem>>) attributes {dimension_semantics = [#tpu.dimension_semantics<arbitrary>], iteration_bounds = array<i64: 1>, scalar_prefetch = 0 : i64, scratch_operands = 0 : i64, tpu.core_type = #tpu.core_type<tc>, window_params = [{pipeline_mode = #tpu.pipeline_mode<synchronous>, transform_indices = @transform_0, window_bounds = array<i64: 648, 36>}, {pipeline_mode = #tpu.pipeline_mode<synchronous>, transform_indices = @transform_1, window_bounds = array<i64: 36, 8>}, {pipeline_mode = #tpu.pipeline_mode<synchronous>, transform_indices = @transform_2, window_bounds = array<i64: 1, 8>}, {pipeline_mode = #tpu.pipeline_mode<synchronous>, transform_indices = @transform_3, window_bounds = array<i64: 72, 16>}, {pipeline_mode = #tpu.pipeline_mode<synchronous>, transform_indices = @transform_4, window_bounds = array<i64: 1, 16>}, {pipeline_mode = #tpu.pipeline_mode<synchronous>, transform_indices = @transform_5, window_bounds = array<i64: 144, 144>}, {pipeline_mode = #tpu.pipeline_mode<synchronous>, transform_indices = @transform_6, window_bounds = array<i64: 1, 144>}, {pipeline_mode = #tpu.pipeline_mode<synchronous>, transform_indices = @transform_7, window_bounds = array<i64: 2, 144>}]} {
    %c0 = arith.constant 0 : index
    %c0_0 = arith.constant 0 : index
    %0 = vector.load %arg1[%c0, %c0_0] : memref<648x36xbf16, #tpu.memory_space<vmem>>, vector<648x36xbf16>
    %c0_1 = arith.constant 0 : index
    %c0_2 = arith.constant 0 : index
    %1 = vector.load %arg2[%c0_1, %c0_2] : memref<36x8xbf16, #tpu.memory_space<vmem>>, vector<36x8xbf16>
    %cst = arith.constant dense<0.000000e+00> : vector<648x8xf32>
    %2 = tpu.matmul %0, %1, %cst {dimension_numbers = #tpu.dot_dimension_numbers<[1], [0], [0], [1], [0, 0, 1, 1], [], []>} : vector<648x36xbf16>, vector<36x8xbf16>, vector<648x8xf32> -> vector<648x8xf32>
    %c0_3 = arith.constant 0 : index
    %c0_4 = arith.constant 0 : index
    %3 = vector.load %arg3[%c0_3, %c0_4] : memref<1x8xf32, #tpu.memory_space<vmem>>, vector<1x8xf32>
    %4 = vector.broadcast %3 : vector<1x8xf32> to vector<648x8xf32>
    %5 = arith.addf %2, %4 : vector<648x8xf32>
    %cst_5 = arith.constant 0.000000e+00 : f32
    %6 = vector.broadcast %cst_5 : f32 to vector<648x8xf32>
    %7 = arith.maximumf %5, %6 : vector<648x8xf32>
    %cst_6 = arith.constant 0.000000e+00 : f32
    %8 = vector.broadcast %cst_6 : f32 to vector<72x16xf32>
    %9 = vector.extract_strided_slice %7 {offsets = [0, 0], sizes = [72, 8], strides = [1, 1]} : vector<648x8xf32> to vector<72x8xf32>
    %10 = arith.truncf %9 : vector<72x8xf32> to vector<72x8xbf16>
    %c0_7 = arith.constant 0 : index
    %c0_8 = arith.constant 0 : index
    %11 = vector.load %arg4[%c0_7, %c0_8] : memref<72x16xbf16, #tpu.memory_space<vmem>>, vector<8x16xbf16>
    %cst_9 = arith.constant dense<0.000000e+00> : vector<72x16xf32>
    %12 = tpu.matmul %10, %11, %cst_9 {dimension_numbers = #tpu.dot_dimension_numbers<[1], [0], [0], [1], [0, 0, 1, 1], [], []>} : vector<72x8xbf16>, vector<8x16xbf16>, vector<72x16xf32> -> vector<72x16xf32>
    %13 = arith.addf %8, %12 : vector<72x16xf32>
    %14 = vector.extract_strided_slice %7 {offsets = [72, 0], sizes = [72, 8], strides = [1, 1]} : vector<648x8xf32> to vector<72x8xf32>
    %15 = arith.truncf %14 : vector<72x8xf32> to vector<72x8xbf16>
    %c8 = arith.constant 8 : index
    %c0_10 = arith.constant 0 : index
    %16 = vector.load %arg4[%c8, %c0_10] : memref<72x16xbf16, #tpu.memory_space<vmem>>, vector<8x16xbf16>
    %cst_11 = arith.constant dense<0.000000e+00> : vector<72x16xf32>
    %17 = tpu.matmul %15, %16, %cst_11 {dimension_numbers = #tpu.dot_dimension_numbers<[1], [0], [0], [1], [0, 0, 1, 1], [], []>} : vector<72x8xbf16>, vector<8x16xbf16>, vector<72x16xf32> -> vector<72x16xf32>
    %18 = arith.addf %13, %17 : vector<72x16xf32>
    %19 = vector.extract_strided_slice %7 {offsets = [144, 0], sizes = [72, 8], strides = [1, 1]} : vector<648x8xf32> to vector<72x8xf32>
    %20 = arith.truncf %19 : vector<72x8xf32> to vector<72x8xbf16>
    %c16 = arith.constant 16 : index
    %c0_12 = arith.constant 0 : index
    %21 = vector.load %arg4[%c16, %c0_12] : memref<72x16xbf16, #tpu.memory_space<vmem>>, vector<8x16xbf16>
    %cst_13 = arith.constant dense<0.000000e+00> : vector<72x16xf32>
    %22 = tpu.matmul %20, %21, %cst_13 {dimension_numbers = #tpu.dot_dimension_numbers<[1], [0], [0], [1], [0, 0, 1, 1], [], []>} : vector<72x8xbf16>, vector<8x16xbf16>, vector<72x16xf32> -> vector<72x16xf32>
    %23 = arith.addf %18, %22 : vector<72x16xf32>
    %24 = vector.extract_strided_slice %7 {offsets = [216, 0], sizes = [72, 8], strides = [1, 1]} : vector<648x8xf32> to vector<72x8xf32>
    %25 = arith.truncf %24 : vector<72x8xf32> to vector<72x8xbf16>
    %c24 = arith.constant 24 : index
    %c0_14 = arith.constant 0 : index
    %26 = vector.load %arg4[%c24, %c0_14] : memref<72x16xbf16, #tpu.memory_space<vmem>>, vector<8x16xbf16>
    %cst_15 = arith.constant dense<0.000000e+00> : vector<72x16xf32>
    %27 = tpu.matmul %25, %26, %cst_15 {dimension_numbers = #tpu.dot_dimension_numbers<[1], [0], [0], [1], [0, 0, 1, 1], [], []>} : vector<72x8xbf16>, vector<8x16xbf16>, vector<72x16xf32> -> vector<72x16xf32>
    %28 = arith.addf %23, %27 : vector<72x16xf32>
    %29 = vector.extract_strided_slice %7 {offsets = [288, 0], sizes = [72, 8], strides = [1, 1]} : vector<648x8xf32> to vector<72x8xf32>
    %30 = arith.truncf %29 : vector<72x8xf32> to vector<72x8xbf16>
    %c32 = arith.constant 32 : index
    %c0_16 = arith.constant 0 : index
    %31 = vector.load %arg4[%c32, %c0_16] : memref<72x16xbf16, #tpu.memory_space<vmem>>, vector<8x16xbf16>
    %cst_17 = arith.constant dense<0.000000e+00> : vector<72x16xf32>
    %32 = tpu.matmul %30, %31, %cst_17 {dimension_numbers = #tpu.dot_dimension_numbers<[1], [0], [0], [1], [0, 0, 1, 1], [], []>} : vector<72x8xbf16>, vector<8x16xbf16>, vector<72x16xf32> -> vector<72x16xf32>
    %33 = arith.addf %28, %32 : vector<72x16xf32>
    %34 = vector.extract_strided_slice %7 {offsets = [360, 0], sizes = [72, 8], strides = [1, 1]} : vector<648x8xf32> to vector<72x8xf32>
    %35 = arith.truncf %34 : vector<72x8xf32> to vector<72x8xbf16>
    %c40 = arith.constant 40 : index
    %c0_18 = arith.constant 0 : index
    %36 = vector.load %arg4[%c40, %c0_18] : memref<72x16xbf16, #tpu.memory_space<vmem>>, vector<8x16xbf16>
    %cst_19 = arith.constant dense<0.000000e+00> : vector<72x16xf32>
    %37 = tpu.matmul %35, %36, %cst_19 {dimension_numbers = #tpu.dot_dimension_numbers<[1], [0], [0], [1], [0, 0, 1, 1], [], []>} : vector<72x8xbf16>, vector<8x16xbf16>, vector<72x16xf32> -> vector<72x16xf32>
    %38 = arith.addf %33, %37 : vector<72x16xf32>
    %39 = vector.extract_strided_slice %7 {offsets = [432, 0], sizes = [72, 8], strides = [1, 1]} : vector<648x8xf32> to vector<72x8xf32>
    %40 = arith.truncf %39 : vector<72x8xf32> to vector<72x8xbf16>
    %c48 = arith.constant 48 : index
    %c0_20 = arith.constant 0 : index
    %41 = vector.load %arg4[%c48, %c0_20] : memref<72x16xbf16, #tpu.memory_space<vmem>>, vector<8x16xbf16>
    %cst_21 = arith.constant dense<0.000000e+00> : vector<72x16xf32>
    %42 = tpu.matmul %40, %41, %cst_21 {dimension_numbers = #tpu.dot_dimension_numbers<[1], [0], [0], [1], [0, 0, 1, 1], [], []>} : vector<72x8xbf16>, vector<8x16xbf16>, vector<72x16xf32> -> vector<72x16xf32>
    %43 = arith.addf %38, %42 : vector<72x16xf32>
    %44 = vector.extract_strided_slice %7 {offsets = [504, 0], sizes = [72, 8], strides = [1, 1]} : vector<648x8xf32> to vector<72x8xf32>
    %45 = arith.truncf %44 : vector<72x8xf32> to vector<72x8xbf16>
    %c56 = arith.constant 56 : index
    %c0_22 = arith.constant 0 : index
    %46 = vector.load %arg4[%c56, %c0_22] : memref<72x16xbf16, #tpu.memory_space<vmem>>, vector<8x16xbf16>
    %cst_23 = arith.constant dense<0.000000e+00> : vector<72x16xf32>
    %47 = tpu.matmul %45, %46, %cst_23 {dimension_numbers = #tpu.dot_dimension_numbers<[1], [0], [0], [1], [0, 0, 1, 1], [], []>} : vector<72x8xbf16>, vector<8x16xbf16>, vector<72x16xf32> -> vector<72x16xf32>
    %48 = arith.addf %43, %47 : vector<72x16xf32>
    %49 = vector.extract_strided_slice %7 {offsets = [576, 0], sizes = [72, 8], strides = [1, 1]} : vector<648x8xf32> to vector<72x8xf32>
    %50 = arith.truncf %49 : vector<72x8xf32> to vector<72x8xbf16>
    %c64 = arith.constant 64 : index
    %c0_24 = arith.constant 0 : index
    %51 = vector.load %arg4[%c64, %c0_24] : memref<72x16xbf16, #tpu.memory_space<vmem>>, vector<8x16xbf16>
    %cst_25 = arith.constant dense<0.000000e+00> : vector<72x16xf32>
    %52 = tpu.matmul %50, %51, %cst_25 {dimension_numbers = #tpu.dot_dimension_numbers<[1], [0], [0], [1], [0, 0, 1, 1], [], []>} : vector<72x8xbf16>, vector<8x16xbf16>, vector<72x16xf32> -> vector<72x16xf32>
    %53 = arith.addf %48, %52 : vector<72x16xf32>
    %c0_26 = arith.constant 0 : index
    %c0_27 = arith.constant 0 : index
    %54 = vector.load %arg5[%c0_26, %c0_27] : memref<1x16xf32, #tpu.memory_space<vmem>>, vector<1x16xf32>
    %55 = vector.broadcast %54 : vector<1x16xf32> to vector<72x16xf32>
    %56 = arith.addf %53, %55 : vector<72x16xf32>
    %cst_28 = arith.constant 0.000000e+00 : f32
    %57 = vector.broadcast %cst_28 : f32 to vector<72x16xf32>
    %58 = arith.maximumf %56, %57 : vector<72x16xf32>
    %cst_29 = arith.constant 0.000000e+00 : f32
    %59 = vector.broadcast %cst_29 : f32 to vector<8x144xf32>
    %60 = vector.extract_strided_slice %58 {offsets = [0, 0], sizes = [8, 16], strides = [1, 1]} : vector<72x16xf32> to vector<8x16xf32>
    %61 = arith.truncf %60 : vector<8x16xf32> to vector<8x16xbf16>
    %c0_30 = arith.constant 0 : index
    %c0_31 = arith.constant 0 : index
    %62 = vector.load %arg6[%c0_30, %c0_31] : memref<144x144xbf16, #tpu.memory_space<vmem>>, vector<16x144xbf16>
    %cst_32 = arith.constant dense<0.000000e+00> : vector<8x144xf32>
    %63 = tpu.matmul %61, %62, %cst_32 {dimension_numbers = #tpu.dot_dimension_numbers<[1], [0], [0], [1], [0, 0, 1, 1], [], []>} : vector<8x16xbf16>, vector<16x144xbf16>, vector<8x144xf32> -> vector<8x144xf32>
    %64 = arith.addf %59, %63 : vector<8x144xf32>
    %65 = vector.extract_strided_slice %58 {offsets = [8, 0], sizes = [8, 16], strides = [1, 1]} : vector<72x16xf32> to vector<8x16xf32>
    %66 = arith.truncf %65 : vector<8x16xf32> to vector<8x16xbf16>
    %c16_33 = arith.constant 16 : index
    %c0_34 = arith.constant 0 : index
    %67 = vector.load %arg6[%c16_33, %c0_34] : memref<144x144xbf16, #tpu.memory_space<vmem>>, vector<16x144xbf16>
    %cst_35 = arith.constant dense<0.000000e+00> : vector<8x144xf32>
    %68 = tpu.matmul %66, %67, %cst_35 {dimension_numbers = #tpu.dot_dimension_numbers<[1], [0], [0], [1], [0, 0, 1, 1], [], []>} : vector<8x16xbf16>, vector<16x144xbf16>, vector<8x144xf32> -> vector<8x144xf32>
    %69 = arith.addf %64, %68 : vector<8x144xf32>
    %70 = vector.extract_strided_slice %58 {offsets = [16, 0], sizes = [8, 16], strides = [1, 1]} : vector<72x16xf32> to vector<8x16xf32>
    %71 = arith.truncf %70 : vector<8x16xf32> to vector<8x16xbf16>
    %c32_36 = arith.constant 32 : index
    %c0_37 = arith.constant 0 : index
    %72 = vector.load %arg6[%c32_36, %c0_37] : memref<144x144xbf16, #tpu.memory_space<vmem>>, vector<16x144xbf16>
    %cst_38 = arith.constant dense<0.000000e+00> : vector<8x144xf32>
    %73 = tpu.matmul %71, %72, %cst_38 {dimension_numbers = #tpu.dot_dimension_numbers<[1], [0], [0], [1], [0, 0, 1, 1], [], []>} : vector<8x16xbf16>, vector<16x144xbf16>, vector<8x144xf32> -> vector<8x144xf32>
    %74 = arith.addf %69, %73 : vector<8x144xf32>
    %75 = vector.extract_strided_slice %58 {offsets = [24, 0], sizes = [8, 16], strides = [1, 1]} : vector<72x16xf32> to vector<8x16xf32>
    %76 = arith.truncf %75 : vector<8x16xf32> to vector<8x16xbf16>
    %c48_39 = arith.constant 48 : index
    %c0_40 = arith.constant 0 : index
    %77 = vector.load %arg6[%c48_39, %c0_40] : memref<144x144xbf16, #tpu.memory_space<vmem>>, vector<16x144xbf16>
    %cst_41 = arith.constant dense<0.000000e+00> : vector<8x144xf32>
    %78 = tpu.matmul %76, %77, %cst_41 {dimension_numbers = #tpu.dot_dimension_numbers<[1], [0], [0], [1], [0, 0, 1, 1], [], []>} : vector<8x16xbf16>, vector<16x144xbf16>, vector<8x144xf32> -> vector<8x144xf32>
    %79 = arith.addf %74, %78 : vector<8x144xf32>
    %80 = vector.extract_strided_slice %58 {offsets = [32, 0], sizes = [8, 16], strides = [1, 1]} : vector<72x16xf32> to vector<8x16xf32>
    %81 = arith.truncf %80 : vector<8x16xf32> to vector<8x16xbf16>
    %c64_42 = arith.constant 64 : index
    %c0_43 = arith.constant 0 : index
    %82 = vector.load %arg6[%c64_42, %c0_43] : memref<144x144xbf16, #tpu.memory_space<vmem>>, vector<16x144xbf16>
    %cst_44 = arith.constant dense<0.000000e+00> : vector<8x144xf32>
    %83 = tpu.matmul %81, %82, %cst_44 {dimension_numbers = #tpu.dot_dimension_numbers<[1], [0], [0], [1], [0, 0, 1, 1], [], []>} : vector<8x16xbf16>, vector<16x144xbf16>, vector<8x144xf32> -> vector<8x144xf32>
    %84 = arith.addf %79, %83 : vector<8x144xf32>
    %85 = vector.extract_strided_slice %58 {offsets = [40, 0], sizes = [8, 16], strides = [1, 1]} : vector<72x16xf32> to vector<8x16xf32>
    %86 = arith.truncf %85 : vector<8x16xf32> to vector<8x16xbf16>
    %c80 = arith.constant 80 : index
    %c0_45 = arith.constant 0 : index
    %87 = vector.load %arg6[%c80, %c0_45] : memref<144x144xbf16, #tpu.memory_space<vmem>>, vector<16x144xbf16>
    %cst_46 = arith.constant dense<0.000000e+00> : vector<8x144xf32>
    %88 = tpu.matmul %86, %87, %cst_46 {dimension_numbers = #tpu.dot_dimension_numbers<[1], [0], [0], [1], [0, 0, 1, 1], [], []>} : vector<8x16xbf16>, vector<16x144xbf16>, vector<8x144xf32> -> vector<8x144xf32>
    %89 = arith.addf %84, %88 : vector<8x144xf32>
    %90 = vector.extract_strided_slice %58 {offsets = [48, 0], sizes = [8, 16], strides = [1, 1]} : vector<72x16xf32> to vector<8x16xf32>
    %91 = arith.truncf %90 : vector<8x16xf32> to vector<8x16xbf16>
    %c96 = arith.constant 96 : index
    %c0_47 = arith.constant 0 : index
    %92 = vector.load %arg6[%c96, %c0_47] : memref<144x144xbf16, #tpu.memory_space<vmem>>, vector<16x144xbf16>
    %cst_48 = arith.constant dense<0.000000e+00> : vector<8x144xf32>
    %93 = tpu.matmul %91, %92, %cst_48 {dimension_numbers = #tpu.dot_dimension_numbers<[1], [0], [0], [1], [0, 0, 1, 1], [], []>} : vector<8x16xbf16>, vector<16x144xbf16>, vector<8x144xf32> -> vector<8x144xf32>
    %94 = arith.addf %89, %93 : vector<8x144xf32>
    %95 = vector.extract_strided_slice %58 {offsets = [56, 0], sizes = [8, 16], strides = [1, 1]} : vector<72x16xf32> to vector<8x16xf32>
    %96 = arith.truncf %95 : vector<8x16xf32> to vector<8x16xbf16>
    %c112 = arith.constant 112 : index
    %c0_49 = arith.constant 0 : index
    %97 = vector.load %arg6[%c112, %c0_49] : memref<144x144xbf16, #tpu.memory_space<vmem>>, vector<16x144xbf16>
    %cst_50 = arith.constant dense<0.000000e+00> : vector<8x144xf32>
    %98 = tpu.matmul %96, %97, %cst_50 {dimension_numbers = #tpu.dot_dimension_numbers<[1], [0], [0], [1], [0, 0, 1, 1], [], []>} : vector<8x16xbf16>, vector<16x144xbf16>, vector<8x144xf32> -> vector<8x144xf32>
    %99 = arith.addf %94, %98 : vector<8x144xf32>
    %100 = vector.extract_strided_slice %58 {offsets = [64, 0], sizes = [8, 16], strides = [1, 1]} : vector<72x16xf32> to vector<8x16xf32>
    %101 = arith.truncf %100 : vector<8x16xf32> to vector<8x16xbf16>
    %c128 = arith.constant 128 : index
    %c0_51 = arith.constant 0 : index
    %102 = vector.load %arg6[%c128, %c0_51] : memref<144x144xbf16, #tpu.memory_space<vmem>>, vector<16x144xbf16>
    %cst_52 = arith.constant dense<0.000000e+00> : vector<8x144xf32>
    %103 = tpu.matmul %101, %102, %cst_52 {dimension_numbers = #tpu.dot_dimension_numbers<[1], [0], [0], [1], [0, 0, 1, 1], [], []>} : vector<8x16xbf16>, vector<16x144xbf16>, vector<8x144xf32> -> vector<8x144xf32>
    %104 = arith.addf %99, %103 : vector<8x144xf32>
    %c0_53 = arith.constant 0 : index
    %c0_54 = arith.constant 0 : index
    %105 = vector.load %arg7[%c0_53, %c0_54] : memref<1x144xf32, #tpu.memory_space<vmem>>, vector<1x144xf32>
    %106 = vector.broadcast %105 : vector<1x144xf32> to vector<8x144xf32>
    %107 = arith.addf %104, %106 : vector<8x144xf32>
    %cst_55 = arith.constant 0.000000e+00 : f32
    %108 = vector.broadcast %cst_55 : f32 to vector<8x144xf32>
    %109 = arith.maximumf %107, %108 : vector<8x144xf32>
    %110 = vector.extract_strided_slice %109 {offsets = [0, 0], sizes = [2, 144], strides = [1, 1]} : vector<8x144xf32> to vector<2x144xf32>
    %c0_56 = arith.constant 0 : index
    %c0_57 = arith.constant 0 : index
    %111 = vector.load %arg8[%c0_56, %c0_57] : memref<2x144xf32, #tpu.memory_space<vmem>>, vector<2x144xf32>
    tpu.vector_store %arg8[%c0_56, %c0_57], %110 {strides = array<i32>} : memref<2x144xf32, #tpu.memory_space<vmem>>, vector<2x144xf32>,
    return
  }
  func.func @transform_0(%arg0: i32) -> (i32, i32) {
    %c0_i32 = arith.constant 0 : i32
    %c0_i32_0 = arith.constant 0 : i32
    %c0_i32_1 = arith.constant 0 : i32
    return %c0_i32, %c0_i32_0 : i32, i32
  }
  func.func @transform_1(%arg0: i32) -> (i32, i32) {
    %c0_i32 = arith.constant 0 : i32
    %c0_i32_0 = arith.constant 0 : i32
    %c0_i32_1 = arith.constant 0 : i32
    return %c0_i32, %c0_i32_0 : i32, i32
  }
  func.func @transform_2(%arg0: i32) -> (i32, i32) {
    %c0_i32 = arith.constant 0 : i32
    %c0_i32_0 = arith.constant 0 : i32
    %c0_i32_1 = arith.constant 0 : i32
    return %c0_i32, %c0_i32_0 : i32, i32
  }
  func.func @transform_3(%arg0: i32) -> (i32, i32) {
    %c0_i32 = arith.constant 0 : i32
    %c0_i32_0 = arith.constant 0 : i32
    %c0_i32_1 = arith.constant 0 : i32
    return %c0_i32, %c0_i32_0 : i32, i32
  }
  func.func @transform_4(%arg0: i32) -> (i32, i32) {
    %c0_i32 = arith.constant 0 : i32
    %c0_i32_0 = arith.constant 0 : i32
    %c0_i32_1 = arith.constant 0 : i32
    return %c0_i32, %c0_i32_0 : i32, i32
  }
  func.func @transform_5(%arg0: i32) -> (i32, i32) {
    %c0_i32 = arith.constant 0 : i32
    %c0_i32_0 = arith.constant 0 : i32
    %c0_i32_1 = arith.constant 0 : i32
    return %c0_i32, %c0_i32_0 : i32, i32
  }
  func.func @transform_6(%arg0: i32) -> (i32, i32) {
    %c0_i32 = arith.constant 0 : i32
    %c0_i32_0 = arith.constant 0 : i32
    %c0_i32_1 = arith.constant 0 : i32
    return %c0_i32, %c0_i32_0 : i32, i32
  }
  func.func @transform_7(%arg0: i32) -> (i32, i32) {
    %c0_i32 = arith.constant 0 : i32
    %c0_i32_0 = arith.constant 0 : i32
    %c0_i32_1 = arith.constant 0 : i32
    return %c0_i32, %c0_i32_0 : i32, i32
  }
}

</mosaic_0001>

<bundles_post_ra>
// kernel: fwd.1
= control target key start
LH: loop header
LB: loop body
LE: loop exit
PB: predicated region body
PF: predicated region fallthrough
CT: control target
= control target key end

     0   :  { %v3160_v1 = vmov 0.0   ;;  %vm3161_vm0 = vmmov 0   ;;  %vm463_vm1 = vcmask 1041408   ;;  %vm339_vm2 = vcmask 293888   ;;  %s3999_s0 = inlined_call_operand.vmem [shape: bf16[648,36], index: 0, kind: input, shape index: {}]   ;;  %s4000_s1 = inlined_call_operand.vmem [shape: bf16[36,8], index: 1, kind: input, shape index: {}]   ;;  %s4001_s2 = inlined_call_operand.vmem [shape: f32[1,8], index: 2, kind: input, shape index: {}]   ;;  %s4002_s3 = inlined_call_operand.vmem [shape: bf16[72,16], index: 3, kind: input, shape index: {}]   ;;  %s4003_s4 = inlined_call_operand.vmem [shape: f32[1,16], index: 4, kind: input, shape index: {}]   ;;  %s4004_s5 = inlined_call_operand.vmem [shape: bf16[144,144], index: 5, kind: input, shape index: {}]   ;;  %s4005_s6 = inlined_call_operand.vmem [shape: f32[1,144], index: 6, kind: input, shape index: {}]   ;;  %s4006_s7 = inlined_call_operand.hbm [shape: f32[2,144], index: 7, kind: output, shape index: {}]  }
   0x1   :  { %v3064_v0 = vld [vmem:[%s4000_s1] sm:$0xff]   ;;  %2691 = vmatprep.subr.bf16.mxu0 %v3160_v1  ;;  %v3065_v2 = vld [vmem:[%s4000_s1 + $0x8] sm:$0xff]   ;;  %2861 = vmatprep.subr.bf16.mxu1 %v3160_v1  ;;  %v3066_v3 = vld [vmem:[%s4000_s1 + $0x10] ss:$0 sps:$4 sm:$0x33]  }
   0x2   :  { %2692 = vmatpush3.bf16.msra.mxu0 %v3064_v0  ;;  %2697 = vmatprep.mubr.msk.bf16.mxu0 %vm3161_vm0, %v3160_v1  ;;  %v465_v4 = vsel %vm463_vm1, %v3066_v3, 0  ;;  %v3067_v5 = vld [vmem:[%s3999_s0] sm:$0xff]   ;;  %v3068_v6 = vld [vmem:[%s3999_s0 + $0x8] sm:$0xff]   ;;  %v3069_v7 = vld [vmem:[%s3999_s0 + $0x10] sm:$0xff]  }
   0x3   :  { %2693 = vmatprep.subr.bf16.mxu0 %v3160_v1  ;;  %2863 = vmatprep.mubr.msk.bf16.mxu1 %vm3161_vm0, %v3160_v1  ;;  %v3070_v8 = vld [vmem:[%s3999_s0 + $0x18] sm:$0xff]   ;;  %v3071_v9 = vld [vmem:[%s3999_s0 + $0x20] sm:$0xff]  }
   0x6   :  { %2694 = vmatpush3.bf16.msra.mxu0 %v3065_v2 }
   0x7   :  { %2695 = vmatprep.subr.bf16.mxu0 %v3160_v1 }
   0xa   :  { %2696 = vmatpush3.bf16.msra.mxu0 %v465_v4 }
   0xd   :  { %2698 = vmatmul.mubr.msk.bf16.vlgmr.msra.gmra.mrb[0].mxu0 %vm339_vm2, %v3067_v5 }
   0xe   :  { %2701 = vmatprep.mubr.msk.bf16.mxu0 %vm3161_vm0, %v3160_v1 }
  0x15   :  { %2702 = vmatmul.mubr.msk.bf16.gmra.mrb[4].mxu0 %vm339_vm2, %v3068_v6 }
  0x16   :  { %2705 = vmatprep.mubr.msk.bf16.mxu0 %vm3161_vm0, %v3160_v1 }
  0x1d   :  { %2706 = vmatmul.mubr.msk.bf16.gmra.mrb[8].mxu0 %vm339_vm2, %v3069_v7 }
  0x1e   :  { %2709 = vmatprep.mubr.msk.bf16.mxu0 %vm3161_vm0, %v3160_v1 }
  0x25   :  { %2710 = vmatmul.mubr.msk.bf16.gmra.mrb[12].mxu0 %vm339_vm2, %v3070_v8 }
  0x26   :  { %2713 = vmatprep.mubr.msk.bf16.mxu0 %vm3161_vm0, %v3160_v1 }
  0x27   :  { %12 = vsyncpa [#allocation3], 0  ;;  %v3072_v10 = vld [vmem:[%s3999_s0 + $0x28] sm:$0xff]   ;;  %v3073_v11 = vld [vmem:[%s3999_s0 + $0x30] sm:$0xff]   ;;  %vm936_vm3 = vcmask 1043456   ;;  %vm920_vm4 = vcmask 64512  }
  0x28   :  { %v3074_v12 = vld [vmem:[%s3999_s0 + $0x38] sm:$0xff]   ;;  %v3075_v13 = vld [vmem:[%s3999_s0 + $0x40] sm:$0xff]   ;;  %v3076_v14 = vld [vmem:[%s3999_s0 + $0x48] sm:$0xff]   ;;  %vm1878_vm5 = vcmask 130048   ;;  %vm2417_vm6 = vcmask 125954  }
  0x29   :  { %v3077_v15 = vld [vmem:[%s3999_s0 + $0x50] sm:$0xff]   ;;  %v3078_v16 = vld [vmem:[%s3999_s0 + $0x58] sm:$0xff]   ;;  %v3079_v17 = vld [vmem:[%s3999_s0 + $0x60] sm:$0xff]  }
  0x2a   :  { %v3080_v18 = vld [vmem:[%s3999_s0 + $0x68] sm:$0xff]   ;;  %v3081_v19 = vld [vmem:[%s3999_s0 + $0x70] sm:$0xff]   ;;  %v3082_v20 = vld [vmem:[%s3999_s0 + $0x78] sm:$0xff]  }
  0x2b   :  { %v3083_v21 = vld [vmem:[%s3999_s0 + $0x80] sm:$0xff]   ;;  %v3084_v24 = vld [vmem:[%s3999_s0 + $0x88] sm:$0xff]   ;;  %v3085_v25 = vld [vmem:[%s3999_s0 + $0x90] sm:$0xff]  }
  0x2c   :  { %v919_v22 = vld [vmem:[%s4002_s3 + $0x4] sm:$0xf]  ;;  %v3086_v26 = vld [vmem:[%s3999_s0 + $0x98] sm:$0xff]   ;;  %v3088_v28 = vld [vmem:[%s3999_s0 + $0xa8] sm:$0xff]  }
  0x2d   :  { %2714 = vmatmul.mubr.msk.bf16.gmra.mrb[16].mxu0 %vm339_vm2, %v3071_v9  ;;  %v938_v23 = vsel %vm936_vm3, %v919_v22, 0  ;;  %v3087_v27 = vld [vmem:[%s3999_s0 + $0xa0] sm:$0xff]   ;;  %v3089_v29 = vld [vmem:[%s3999_s0 + $0xb0] sm:$0xff]   ;;  %v3090_v30 = vld [vmem:[%s3999_s0 + $0xb8] sm:$0xff]  }
  0x2e   :  { %2717 = vmatprep.mubr.msk.bf16.mxu0 %vm3161_vm0, %v3160_v1  ;;  %2862 = vmatpush3.bf16.msra.mxu1 %v938_v23  ;;  %v3091_v31 = vld [vmem:[%s3999_s0 + $0xc0] sm:$0xff]   ;;  %v3092_v32 = vld [vmem:[%s3999_s0 + $0xc8] sm:$0xff]   ;;  %v3093_v33 = vld [vmem:[%s3999_s0 + $0xd0] sm:$0xff]  }
  0x2f   :  { %2883 = vmatprep.subr.bf16.mxu1 %v3160_v1  ;;  %v3391_v34 = vld [vmem:[%s4001_s2] ss:$0 sm:$0xff]  ;;  %v3094_v38 = vld [vmem:[%s3999_s0 + $0xd8] sm:$0xff]   ;;  %v3096_v58 = vld [vmem:[%s3999_s0 + $0xe8] sm:$0xff]  }
  0x30   :  { %v3095_v48 = vld [vmem:[%s3999_s0 + $0xe0] sm:$0xff]   ;;  %v3097_v5 = vld [vmem:[%s3999_s0 + $0xf0] sm:$0xff]   ;;  %vm2418_vm7 = vmor %vm2417_vm6, %vm463_vm1 }
  0x31   :  { %v913_v23 = vld [vmem:[%s4002_s3] sm:$0xf] }
  0x35   :  { %2718 = vmatmul.mubr.msk.bf16.gmra.mrb[20].mxu0 %vm339_vm2, %v3072_v10 }
  0x36   :  { %2721 = vmatprep.mubr.msk.bf16.mxu0 %vm3161_vm0, %v3160_v1 }
  0x3d   :  { %2722 = vmatmul.mubr.msk.bf16.gmra.mrb[24].mxu0 %vm339_vm2, %v3073_v11 }
  0x3e   :  { %2725 = vmatprep.mubr.msk.bf16.mxu0 %vm3161_vm0, %v3160_v1 }
  0x45   :  { %2726 = vmatmul.mubr.msk.bf16.gmra.mrb[28].mxu0 %vm339_vm2, %v3074_v12 }
  0x46   :  { %2729 = vmatprep.mubr.msk.bf16.mxu0 %vm3161_vm0, %v3160_v1 }
  0x4d   :  { %2730 = vmatmul.mubr.msk.bf16.gmra.mrb[32].mxu0 %vm339_vm2, %v3075_v13 }
  0x4e   :  { %2733 = vmatprep.mubr.msk.bf16.mxu0 %vm3161_vm0, %v3160_v1 }
  0x55   :  { %2734 = vmatmul.mubr.msk.bf16.gmra.mrb[36].mxu0 %vm339_vm2, %v3076_v14  ;;  %v3098_v14 = vld [vmem:[%s3999_s0 + $0xf8] sm:$0xff]  }
  0x56   :  { %2737 = vmatprep.mubr.msk.bf16.mxu0 %vm3161_vm0, %v3160_v1 }
  0x5d   :  { %2738 = vmatmul.mubr.msk.bf16.gmra.mrb[40].mxu0 %vm339_vm2, %v3077_v15 }
  0x5e   :  { %2741 = vmatprep.mubr.msk.bf16.mxu0 %vm3161_vm0, %v3160_v1 }
  0x65   :  { %2742 = vmatmul.mubr.msk.bf16.gmra.mrb[44].mxu0 %vm339_vm2, %v3078_v16 }
  0x66   :  { %2745 = vmatprep.mubr.msk.bf16.mxu0 %vm3161_vm0, %v3160_v1 }
  0x6d   :  { %2746 = vmatmul.mubr.msk.bf16.gmra.mrb[48].mxu0 %vm339_vm2, %v3079_v17 }
  0x6e   :  { %2749 = vmatprep.mubr.msk.bf16.mxu0 %vm3161_vm0, %v3160_v1 }
  0x75   :  { %2750 = vmatmul.mubr.msk.bf16.gmra.mrb[52].mxu0 %vm339_vm2, %v3080_v18 }
  0x76   :  { %2753 = vmatprep.mubr.msk.bf16.mxu0 %vm3161_vm0, %v3160_v1 }
  0x7d   :  { %2754 = vmatmul.mubr.msk.bf16.gmra.mrb[56].mxu0 %vm339_vm2, %v3081_v19 }
  0x7e   :  { %2757 = vmatprep.mubr.msk.bf16.mxu0 %vm3161_vm0, %v3160_v1 }
  0x85   :  { %2758 = vmatmul.mubr.msk.bf16.gmra.mrb[60].mxu0 %vm339_vm2, %v3082_v20 }
  0x86   :  { %2761 = vmatprep.mubr.msk.bf16.mxu0 %vm3161_vm0, %v3160_v1 }
  0x8d   :  { %2762 = vmatmul.mubr.msk.bf16.gmra.mrb[64].mxu0 %vm339_vm2, %v3083_v21  ;;  %v3099_v21 = vld [vmem:[%s3999_s0 + $0x100] sm:$0xff]  }
  0x8e   :  { %2765 = vmatprep.mubr.msk.bf16.mxu0 %vm3161_vm0, %v3160_v1 }
  0x95   :  { %2766 = vmatmul.mubr.msk.bf16.gmra.mrb[68].mxu0 %vm339_vm2, %v3084_v24 }
  0x96   :  { %2769 = vmatprep.mubr.msk.bf16.mxu0 %vm3161_vm0, %v3160_v1 }
  0x9d   :  { %2770 = vmatmul.mubr.msk.bf16.gmra.mrb[72].mxu0 %vm339_vm2, %v3085_v25 }
  0x9e   :  { %2773 = vmatprep.mubr.msk.bf16.mxu0 %vm3161_vm0, %v3160_v1 }
  0xa5   :  { %2774 = vmatmul.mubr.msk.bf16.gmra.mrb[76].mxu0 %vm339_vm2, %v3086_v26 }
  0xa6   :  { %2777 = vmatprep.mubr.msk.bf16.mxu0 %vm3161_vm0, %v3160_v1 }
  0xad   :  { %2778 = vmatmul.mubr.msk.bf16.gmra.mrb[80].mxu0 %vm339_vm2, %v3087_v27 }
  0xae   :  { %2781 = vmatprep.mubr.msk.bf16.mxu0 %vm3161_vm0, %v3160_v1 }
  0xb5   :  { %2782 = vmatmul.mubr.msk.bf16.gmra.mrb[84].mxu0 %vm339_vm2, %v3088_v28  ;;  %v1028_v28 = vsel %vm936_vm3, %v913_v23, 0 }
  0xb6   :  { %2785 = vmatprep.mubr.msk.bf16.mxu0 %vm3161_vm0, %v3160_v1 }
  0xbd   :  { %2786 = vmatmul.mubr.msk.bf16.gmra.mrb[88].mxu0 %vm339_vm2, %v3089_v29 }
  0xbe   :  { %2789 = vmatprep.mubr.msk.bf16.mxu0 %vm3161_vm0, %v3160_v1 }
  0xc5   :  { %2790 = vmatmul.mubr.msk.bf16.gmra.mrb[92].mxu0 %vm339_vm2, %v3090_v30 }
  0xc6   :  { %2793 = vmatprep.mubr.msk.bf16.mxu0 %vm3161_vm0, %v3160_v1 }
  0xcd   :  { %2794 = vmatmul.mubr.msk.bf16.gmra.mrb[96].mxu0 %vm339_vm2, %v3091_v31 }
  0xce   :  { %2797 = vmatprep.mubr.msk.bf16.mxu0 %vm3161_vm0, %v3160_v1 }
  0xd5   :  { %2798 = vmatmul.mubr.msk.bf16.gmra.mrb[100].mxu0 %vm339_vm2, %v3092_v32 }
  0xd6   :  { %2801 = vmatprep.mubr.msk.bf16.mxu0 %vm3161_vm0, %v3160_v1 }
  0xdd   :  { %2802 = vmatmul.mubr.msk.bf16.gmra.mrb[104].mxu0 %vm339_vm2, %v3093_v33  ;;  %v3100_v33 = vld [vmem:[%s3999_s0 + $0x108] sm:$0xff]  }
  0xde   :  { %2805 = vmatprep.mubr.msk.bf16.mxu0 %vm3161_vm0, %v3160_v1 }
  0xe0   :  { %v501_v35 = vpop.f32.mrb[0].mxu0 }
  0xe1   :  { %v502_v36 = vadd.f32 %v3391_v34, %v501_v35  ;;  %v2699_v37 = vpop.f32.mrb[1].mxu0 }
  0xe2   :  { %v504_v39 = vpop.f32.mrb[2].mxu0 }
  0xe3   :  { %v505_v40 = vadd.f32 %v3391_v34, %v504_v39  ;;  %v2700_v41 = vpop.f32.mrb[3].mxu0  ;;  %v827_v42 = vmax.f32 %v502_v36, 0.0 }
  0xe5   :  { %v828_v43 = vmax.f32 %v505_v40, 0.0  ;;  %2806 = vmatmul.mubr.msk.bf16.gmra.mrb[108].mxu0 %vm339_vm2, %v3094_v38 }
  0xe6   :  { %2809 = vmatprep.mubr.msk.bf16.mxu0 %vm3161_vm0, %v3160_v1 }
  0xe7   :  { %v3403_v44 = vpack.c.bf16 %v828_v43, %v827_v42 }
  0xe8   :  { %v509_v45 = vpop.f32.mrb[4].mxu0 }
  0xe9   :  { %v510_v46 = vadd.f32 %v3391_v34, %v509_v45  ;;  %v2703_v47 = vpop.f32.mrb[5].mxu0  ;;  %v3101_v45 = vld [vmem:[%s3999_s0 + $0x110] sm:$0xff]  }
  0xea   :  { %v512_v49 = vpop.f32.mrb[6].mxu0 }
  0xeb   :  { %v513_v50 = vadd.f32 %v3391_v34, %v512_v49  ;;  %v2704_v51 = vpop.f32.mrb[7].mxu0  ;;  %v829_v52 = vmax.f32 %v510_v46, 0.0 }
  0xed   :  { %v830_v53 = vmax.f32 %v513_v50, 0.0  ;;  %2810 = vmatmul.mubr.msk.bf16.gmra.mrb[112].mxu0 %vm339_vm2, %v3095_v48 }
  0xee   :  { %2813 = vmatprep.mubr.msk.bf16.mxu0 %vm3161_vm0, %v3160_v1 }
  0xef   :  { %v3413_v54 = vpack.c.bf16 %v830_v53, %v829_v52 }
  0xf0   :  { %v517_v55 = vpop.f32.mrb[8].mxu0 }
  0xf1   :  { %v518_v56 = vadd.f32 %v3391_v34, %v517_v55  ;;  %v2707_v57 = vpop.f32.mrb[9].mxu0 }
  0xf2   :  { %v520_v59 = vpop.f32.mrb[10].mxu0 }
  0xf3   :  { %v521_v60 = vadd.f32 %v3391_v34, %v520_v59  ;;  %v2708_v61 = vpop.f32.mrb[11].mxu0  ;;  %v831_v62 = vmax.f32 %v518_v56, 0.0  ;;  %v3102_v56 = vld [vmem:[%s3999_s0 + $0x118] sm:$0xff]  }
  0xf5   :  { %v832_v63 = vmax.f32 %v521_v60, 0.0  ;;  %2814 = vmatmul.mubr.msk.bf16.gmra.mrb[116].mxu0 %vm339_vm2, %v3096_v58 }
  0xf6   :  { %2817 = vmatprep.mubr.msk.bf16.mxu0 %vm3161_vm0, %v3160_v1 }
  0xf7   :  { %v3423_v0 = vpack.c.bf16 %v832_v63, %v831_v62 }
  0xf8   :  { %v525_v2 = vpop.f32.mrb[12].mxu0 }
  0xf9   :  { %v526_v3 = vadd.f32 %v3391_v34, %v525_v2  ;;  %v2711_v4 = vpop.f32.mrb[13].mxu0 }
  0xfa   :  { %v528_v6 = vpop.f32.mrb[14].mxu0 }
  0xfb   :  { %v529_v7 = vadd.f32 %v3391_v34, %v528_v6  ;;  %v2712_v8 = vpop.f32.mrb[15].mxu0  ;;  %v833_v9 = vmax.f32 %v526_v3, 0.0 }
  0xfd   :  { %v834_v10 = vmax.f32 %v529_v7, 0.0  ;;  %2818 = vmatmul.mubr.msk.bf16.gmra.mrb[120].mxu0 %vm339_vm2, %v3097_v5  ;;  %v3103_v5 = vld [vmem:[%s3999_s0 + $0x120] sm:$0xff]  }
  0xfe   :  { %2821 = vmatprep.mubr.msk.bf16.mxu0 %vm3161_vm0, %v3160_v1 }
  0xff   :  { %v3433_v11 = vpack.c.bf16 %v834_v10, %v833_v9 }
 0x100   :  { %v3435_v12 = vpop.f32.mrb[16].mxu0 }
 0x101   :  { %v2715_v13 = vpop.f32.mrb[17].mxu0 }
 0x102   :  { %v536_v15 = vpop.f32.mrb[18].mxu0 }
 0x103   :  { %v2716_v16 = vpop.f32.mrb[19].mxu0  ;;  %v537_v17 = vadd.f32 %v3391_v34, %v536_v15 }
 0x105   :  { %2822 = vmatmul.mubr.msk.bf16.gmra.mrb[124].mxu0 %vm339_vm2, %v3098_v14  ;;  %v836_v24 = vmax.f32 %v537_v17, 0.0 }
 0x106   :  { %2825 = vmatprep.mubr.msk.bf16.mxu0 %vm3161_vm0, %v3160_v1 }
 0x108   :  { %v541_v18 = vpop.f32.mrb[20].mxu0 }
 0x109   :  { %v542_v19 = vadd.f32 %v3391_v34, %v541_v18  ;;  %v2719_v20 = vpop.f32.mrb[21].mxu0  ;;  %v3104_v18 = vld [vmem:[%s3999_s0 + $0x128] sm:$0xff]  }
 0x10a   :  { %v544_v22 = vpop.f32.mrb[22].mxu0 }
 0x10b   :  { %v837_v25 = vmax.f32 %v542_v19, 0.0  ;;  %v2720_v26 = vpop.f32.mrb[23].mxu0  ;;  %v545_v29 = vadd.f32 %v3391_v34, %v544_v22  ;;  %v1107_v19 = vld [vmem:[%s4002_s3 + $0x8] sm:$0xf] }
 0x10d   :  { %v914_v27 = vpack.c.bf16 %v837_v25, %v836_v24  ;;  %2826 = vmatmul.mubr.msk.bf16.gmra.mrb[128].mxu0 %vm339_vm2, %v3099_v21  ;;  %v838_v36 = vmax.f32 %v545_v29, 0.0  ;;  %v1124_v24 = vsel %vm936_vm3, %v1107_v19, 0 }
 0x10e   :  { %2829 = vmatprep.mubr.msk.bf16.mxu0 %vm3161_vm0, %v3160_v1 }
 0x10f   :  { %2864 = vmatmul.mubr.msk.bf16.vlgmr.msra.gmra.mrb[0].mxu1 %vm920_vm4, %v914_v27 }
 0x110   :  { %2884 = vmatpush3.bf16.msra.mxu1 %v1028_v28  ;;  %v549_v30 = vpop.f32.mrb[24].mxu0  ;;  %2867 = vmatprep.mubr.msk.bf16.mxu1 %vm3161_vm0, %v3160_v1 }
 0x111   :  { %v550_v31 = vadd.f32 %v3391_v34, %v549_v30  ;;  %v2723_v32 = vpop.f32.mrb[25].mxu0  ;;  %2905 = vmatprep.subr.bf16.mxu1 %v3160_v1  ;;  %v3105_v30 = vld [vmem:[%s3999_s0 + $0x130] sm:$0xff]  }
 0x112   :  { %v552_v35 = vpop.f32.mrb[26].mxu0 }
 0x113   :  { %v839_v37 = vmax.f32 %v550_v31, 0.0  ;;  %v2724_v38 = vpop.f32.mrb[27].mxu0  ;;  %v553_v40 = vadd.f32 %v3391_v34, %v552_v35 }
 0x115   :  { %v915_v39 = vpack.c.bf16 %v839_v37, %v838_v36  ;;  %2830 = vmatmul.mubr.msk.bf16.gmra.mrb[132].mxu0 %vm339_vm2, %v3100_v33  ;;  %v840_v47 = vmax.f32 %v553_v40, 0.0  ;;  %v3106_v40 = vld [vmem:[%s3999_s0 + $0x138] sm:$0xff]  }
 0x116   :  { %2833 = vmatprep.mubr.msk.bf16.mxu0 %vm3161_vm0, %v3160_v1 }
 0x117   :  { %2868 = vmatmul.mubr.msk.bf16.gmra.mrb[4].mxu1 %vm920_vm4, %v915_v39 }
 0x118   :  { %v557_v41 = vpop.f32.mrb[28].mxu0  ;;  %2871 = vmatprep.mubr.msk.bf16.mxu1 %vm3161_vm0, %v3160_v1 }
 0x119   :  { %v558_v42 = vadd.f32 %v3391_v34, %v557_v41  ;;  %v2727_v43 = vpop.f32.mrb[29].mxu0 }
 0x11a   :  { %v560_v46 = vpop.f32.mrb[30].mxu0 }
 0x11b   :  { %v841_v48 = vmax.f32 %v558_v42, 0.0  ;;  %v2728_v49 = vpop.f32.mrb[31].mxu0  ;;  %v561_v51 = vadd.f32 %v3391_v34, %v560_v46 }
 0x11c   :  { %v3107_v49 = vld [vmem:[%s3999_s0 + $0x140] ss:$0 sps:$4 sm:$0xff]  }
 0x11d   :  { %v916_v50 = vpack.c.bf16 %v841_v48, %v840_v47  ;;  %2834 = vmatmul.mubr.msk.bf16.gmra.mrb[136].mxu0 %vm339_vm2, %v3101_v45  ;;  %v842_v58 = vmax.f32 %v561_v51, 0.0 }
 0x11e   :  { %2837 = vmatprep.mubr.msk.bf16.mxu0 %vm3161_vm0, %v3160_v1 }
 0x11f   :  { %2872 = vmatmul.mubr.msk.bf16.gmra.mrb[8].mxu1 %vm920_vm4, %v916_v50 }
 0x120   :  { %v565_v52 = vpop.f32.mrb[32].mxu0  ;;  %2875 = vmatprep.mubr.msk.bf16.mxu1 %vm3161_vm0, %v3160_v1 }
 0x121   :  { %v566_v53 = vadd.f32 %v3391_v34, %v565_v52  ;;  %v2731_v55 = vpop.f32.mrb[33].mxu0  ;;  %v534_v52 = vadd.f32 %v3391_v34, %v3435_v12 }
 0x122   :  { %v568_v57 = vpop.f32.mrb[34].mxu0 }
 0x123   :  { %v843_v59 = vmax.f32 %v566_v53, 0.0  ;;  %v2732_v60 = vpop.f32.mrb[35].mxu0  ;;  %v569_v62 = vadd.f32 %v3391_v34, %v568_v57  ;;  %v835_v55 = vmax.f32 %v534_v52, 0.0 }
 0x125   :  { %v917_v61 = vpack.c.bf16 %v843_v59, %v842_v58  ;;  %2838 = vmatmul.mubr.msk.bf16.gmra.mrb[140].mxu0 %vm339_vm2, %v3102_v56  ;;  %v844_v2 = vmax.f32 %v569_v62, 0.0  ;;  %v912_v12 = vpack.c.bf16 %v835_v55, %v835_v55 }
 0x126   :  { %2841 = vmatprep.mubr.msk.bf16.mxu0 %vm3161_vm0, %v3160_v1 }
 0x127   :  { %2876 = vmatmul.mubr.msk.bf16.gmra.mrb[12].mxu1 %vm920_vm4, %v917_v61  ;;  %v918_v10 = vpack.c.bf16 %v844_v2, %v844_v2 }
 0x128   :  { %2879 = vmatprep.mubr.msk.bf16.mxu1 %vm3161_vm0, %v3160_v1  ;;  %v573_v63 = vpop.f32.mrb[36].mxu0 }
 0x129   :  { %v574_v3 = vadd.f32 %v3391_v34, %v573_v63  ;;  %v2735_v4 = vpop.f32.mrb[37].mxu0 }
 0x12a   :  { %v576_v6 = vpop.f32.mrb[38].mxu0 }
 0x12b   :  { %v845_v7 = vmax.f32 %v574_v3, 0.0  ;;  %v577_v8 = vadd.f32 %v3391_v34, %v576_v6  ;;  %v2736_v9 = vpop.f32.mrb[39].mxu0 }
 0x12d   :  { %v846_v13 = vmax.f32 %v577_v8, 0.0  ;;  %2842 = vmatmul.mubr.msk.bf16.gmra.mrb[144].mxu0 %vm339_vm2, %v3103_v5  ;;  %v1212_v5 = vld [vmem:[%s4002_s3 + $0xc] sm:$0xf] }
 0x12e   :  { %2845 = vmatprep.mubr.msk.bf16.mxu0 %vm3161_vm0, %v3160_v1  ;;  %v1229_v9 = vsel %vm936_vm3, %v1212_v5, 0 }
 0x12f   :  { %2880 = vmatmul.mubr.msk.bf16.gmra.mrb[16].mxu1 %vm920_vm4, %v918_v10  ;;  %v3502_v14 = vpack.c.bf16 %v846_v13, %v845_v7 }
 0x130   :  { %2885 = vmatprep.mubr.msk.bf16.mxu1 %vm3161_vm0, %v3160_v1  ;;  %v581_v15 = vpop.f32.mrb[40].mxu0 }
 0x131   :  { %v582_v16 = vadd.f32 %v3391_v34, %v581_v15  ;;  %v2739_v17 = vpop.f32.mrb[41].mxu0 }
 0x132   :  { %v584_v20 = vpop.f32.mrb[42].mxu0 }
 0x133   :  { %v847_v21 = vmax.f32 %v582_v16, 0.0  ;;  %v585_v22 = vadd.f32 %v3391_v34, %v584_v20  ;;  %v2740_v23 = vpop.f32.mrb[43].mxu0 }
 0x135   :  { %v848_v25 = vmax.f32 %v585_v22, 0.0  ;;  %2846 = vmatmul.mubr.msk.bf16.gmra.mrb[148].mxu0 %vm339_vm2, %v3104_v18  ;;  %v3108_v22 = vld [vmem:[%s4004_s5 + $0x10] ss:$8 sps:$4 sm:$0xff]  }
 0x136   :  { %2849 = vmatprep.mubr.msk.bf16.mxu0 %vm3161_vm0, %v3160_v1 }
 0x137   :  { %2886 = vmatmul.mubr.msk.bf16.vlgmr.msra.gmra.mrb[20].mxu1 %vm920_vm4, %v3403_v44  ;;  %v3520_v26 = vpack.c.bf16 %v848_v25, %v847_v21 }
 0x138   :  { %2906 = vmatpush3.bf16.msra.mxu1 %v1124_v24  ;;  %2889 = vmatprep.mubr.msk.bf16.mxu1 %vm3161_vm0, %v3160_v1  ;;  %v589_v27 = vpop.f32.mrb[44].mxu0 }
 0x139   :  { %2927 = vmatprep.subr.bf16.mxu1 %v3160_v1  ;;  %v590_v28 = vadd.f32 %v3391_v34, %v589_v27  ;;  %v2743_v29 = vpop.f32.mrb[45].mxu0 }
 0x13a   :  { %v592_v31 = vpop.f32.mrb[46].mxu0 }
 0x13b   :  { %v849_v32 = vmax.f32 %v590_v28, 0.0  ;;  %v593_v44 = vadd.f32 %v3391_v34, %v592_v31  ;;  %v2744_v33 = vpop.f32.mrb[47].mxu0 }
 0x13d   :  { %v850_v35 = vmax.f32 %v593_v44, 0.0  ;;  %2850 = vmatmul.mubr.msk.bf16.gmra.mrb[152].mxu0 %vm339_vm2, %v3105_v30 }
 0x13e   :  { %2853 = vmatprep.mubr.msk.bf16.mxu0 %vm3161_vm0, %v3160_v1 }
 0x13f   :  { %2890 = vmatmul.mubr.msk.bf16.gmra.mrb[24].mxu1 %vm920_vm4, %v3413_v54  ;;  %v3535_v36 = vpack.c.bf16 %v850_v35, %v849_v32 }
 0x140   :  { %2893 = vmatprep.mubr.msk.bf16.mxu1 %vm3161_vm0, %v3160_v1  ;;  %v597_v37 = vpop.f32.mrb[48].mxu0 }
 0x141   :  { %v598_v38 = vadd.f32 %v3391_v34, %v597_v37  ;;  %v2747_v39 = vpop.f32.mrb[49].mxu0 }
 0x142   :  { %v600_v41 = vpop.f32.mrb[50].mxu0 }
 0x143   :  { %v851_v42 = vmax.f32 %v598_v38, 0.0  ;;  %v601_v43 = vadd.f32 %v3391_v34, %v600_v41  ;;  %v2748_v45 = vpop.f32.mrb[51].mxu0 }
 0x145   :  { %v852_v46 = vmax.f32 %v601_v43, 0.0  ;;  %2854 = vmatmul.mubr.msk.bf16.gmra.mrb[156].mxu0 %vm339_vm2, %v3106_v40 }
 0x146   :  { %2857 = vmatprep.mubr.msk.bf16.mxu0 %vm3161_vm0, %v3160_v1 }
 0x147   :  { %2894 = vmatmul.mubr.msk.bf16.gmra.mrb[28].mxu1 %vm920_vm4, %v3423_v0  ;;  %v3549_v54 = vpack.c.bf16 %v852_v46, %v851_v42 }
 0x148   :  { %2897 = vmatprep.mubr.msk.bf16.mxu1 %vm3161_vm0, %v3160_v1  ;;  %v3553_v47 = vpop.f32.mrb[52].mxu0 }
 0x149   :  { %v2751_v48 = vpop.f32.mrb[53].mxu0  ;;  %v606_v38 = vadd.f32 %v3391_v34, %v3553_v47 }
 0x14a   :  { %v608_v50 = vpop.f32.mrb[54].mxu0 }
 0x14b   :  { %v2752_v51 = vpop.f32.mrb[55].mxu0  ;;  %v609_v53 = vadd.f32 %v3391_v34, %v608_v50  ;;  %v853_v43 = vmax.f32 %v606_v38, 0.0 }
 0x14d   :  { %2858 = vmatmul.mubr.msk.bf16.gmra.mrb[160].mxu0 %vm339_vm2, %v3107_v49  ;;  %v854_v56 = vmax.f32 %v609_v53, 0.0  ;;  %v1106_v47 = vpack.c.bf16 %v853_v43, %v853_v43  ;;  %v1422_v43 = vld [vmem:[%s4002_s3 + $0x14] sm:$0xf] }
 0x14f   :  { %2898 = vmatmul.mubr.msk.bf16.gmra.mrb[32].mxu1 %vm920_vm4, %v3433_v11 }
 0x150   :  { %2901 = vmatprep.mubr.msk.bf16.mxu1 %vm3161_vm0, %v3160_v1  ;;  %v613_v0 = vpop.f32.mrb[56].mxu0 }
 0x151   :  { %v614_v57 = vadd.f32 %v3391_v34, %v613_v0  ;;  %v2755_v58 = vpop.f32.mrb[57].mxu0 }
 0x152   :  { %v616_v59 = vpop.f32.mrb[58].mxu0 }
 0x153   :  { %v855_v60 = vmax.f32 %v614_v57, 0.0  ;;  %v2756_v61 = vpop.f32.mrb[59].mxu0  ;;  %v617_v63 = vadd.f32 %v3391_v34, %v616_v59  ;;  %v1317_v57 = vld [vmem:[%s4002_s3 + $0x10] sm:$0xf] }
 0x155   :  { %v3567_v62 = vpack.c.bf16 %v855_v60, %v854_v56  ;;  %v856_v2 = vmax.f32 %v617_v63, 0.0 }
 0x157   :  { %2902 = vmatmul.mubr.msk.bf16.gmra.mrb[36].mxu1 %vm920_vm4, %v912_v12  ;;  %v1334_v12 = vsel %vm936_vm3, %v1317_v57, 0 }
 0x158   :  { %2907 = vmatprep.mubr.msk.bf16.mxu1 %vm3161_vm0, %v3160_v1  ;;  %v621_v11 = vpop.f32.mrb[60].mxu0 }
 0x159   :  { %v622_v3 = vadd.f32 %v3391_v34, %v621_v11  ;;  %v2759_v4 = vpop.f32.mrb[61].mxu0 }
 0x15a   :  { %v624_v6 = vpop.f32.mrb[62].mxu0 }
 0x15b   :  { %v857_v7 = vmax.f32 %v622_v3, 0.0  ;;  %v2760_v8 = vpop.f32.mrb[63].mxu0  ;;  %v625_v13 = vadd.f32 %v3391_v34, %v624_v6 }
 0x15d   :  { %v3578_v10 = vpack.c.bf16 %v857_v7, %v856_v2  ;;  %v858_v16 = vmax.f32 %v625_v13, 0.0 }
 0x15f   :  { %2908 = vmatmul.mubr.msk.bf16.vlgmr.msra.gmra.mrb[40].mxu1 %vm920_vm4, %v3502_v14  ;;  %v3110_v14 = vld [vmem:[%s4004_s5 + $0x14] ss:$8 sps:$4 sm:$0xff]  }
 0x160   :  { %2928 = vmatpush3.bf16.msra.mxu1 %v1229_v9  ;;  %2911 = vmatprep.mubr.msk.bf16.mxu1 %vm3161_vm0, %v3160_v1  ;;  %v629_v15 = vpop.f32.mrb[64].mxu0 }
 0x161   :  { %2949 = vmatprep.subr.bf16.mxu1 %v3160_v1  ;;  %v630_v17 = vadd.f32 %v3391_v34, %v629_v15  ;;  %v2763_v18 = vpop.f32.mrb[65].mxu0  ;;  %1882 = vmatprep.subr.bf16.mxu0 %v3110_v14 }
 0x162   :  { %v632_v19 = vpop.f32.mrb[66].mxu0  ;;  %1883 = vmatpush1.bf16.msra.mxu0 %v3108_v22 }
 0x163   :  { %v859_v20 = vmax.f32 %v630_v17, 0.0  ;;  %v2764_v21 = vpop.f32.mrb[67].mxu0  ;;  %v633_v24 = vadd.f32 %v3391_v34, %v632_v19 }
 0x165   :  { %v3593_v23 = vpack.c.bf16 %v859_v20, %v858_v16  ;;  %v860_v27 = vmax.f32 %v633_v24, 0.0 }
 0x167   :  { %2912 = vmatmul.mubr.msk.bf16.gmra.mrb[44].mxu1 %vm920_vm4, %v3520_v26 }
 0x168   :  { %2915 = vmatprep.mubr.msk.bf16.mxu1 %vm3161_vm0, %v3160_v1  ;;  %v637_v25 = vpop.f32.mrb[68].mxu0 }
 0x169   :  { %v638_v28 = vadd.f32 %v3391_v34, %v637_v25  ;;  %v2767_v29 = vpop.f32.mrb[69].mxu0 }
 0x16a   :  { %v3601_v30 = vpop.f32.mrb[70].mxu0 }
 0x16b   :  { %v861_v31 = vmax.f32 %v638_v28, 0.0  ;;  %v2768_v32 = vpop.f32.mrb[71].mxu0  ;;  %v641_v25 = vadd.f32 %v3391_v34, %v3601_v30 }
 0x16d   :  { %v3603_v44 = vpack.c.bf16 %v861_v31, %v860_v27  ;;  %v862_v29 = vmax.f32 %v641_v25, 0.0 }
 0x16f   :  { %2916 = vmatmul.mubr.msk.bf16.gmra.mrb[48].mxu1 %vm920_vm4, %v3535_v36  ;;  %v1211_v30 = vpack.c.bf16 %v862_v29, %v862_v29 }
 0x170   :  { %2919 = vmatprep.mubr.msk.bf16.mxu1 %vm3161_vm0, %v3160_v1  ;;  %v645_v26 = vpop.f32.mrb[72].mxu0 }
 0x171   :  { %v646_v33 = vadd.f32 %v3391_v34, %v645_v26  ;;  %v2771_v35 = vpop.f32.mrb[73].mxu0 }
 0x172   :  { %v648_v37 = vpop.f32.mrb[74].mxu0 }
 0x173   :  { %v863_v39 = vmax.f32 %v646_v33, 0.0  ;;  %v649_v40 = vadd.f32 %v3391_v34, %v648_v37  ;;  %v2772_v41 = vpop.f32.mrb[75].mxu0 }
 0x175   :  { %v864_v42 = vmax.f32 %v649_v40, 0.0 }
 0x177   :  { %2920 = vmatmul.mubr.msk.bf16.gmra.mrb[52].mxu1 %vm920_vm4, %v3549_v54  ;;  %v3615_v36 = vpack.c.bf16 %v864_v42, %v863_v39 }
 0x178   :  { %2923 = vmatprep.mubr.msk.bf16.mxu1 %vm3161_vm0, %v3160_v1  ;;  %v653_v45 = vpop.f32.mrb[76].mxu0 }
 0x179   :  { %v654_v46 = vadd.f32 %v3391_v34, %v653_v45  ;;  %v2775_v48 = vpop.f32.mrb[77].mxu0 }
 0x17a   :  { %v656_v49 = vpop.f32.mrb[78].mxu0 }
 0x17b   :  { %v865_v50 = vmax.f32 %v654_v46, 0.0  ;;  %v657_v51 = vadd.f32 %v3391_v34, %v656_v49  ;;  %v2776_v52 = vpop.f32.mrb[79].mxu0  ;;  %v1439_v49 = vsel %vm936_vm3, %v1422_v43, 0 }
 0x17d   :  { %v866_v53 = vmax.f32 %v657_v51, 0.0 }
 0x17f   :  { %2924 = vmatmul.mubr.msk.bf16.gmra.mrb[56].mxu1 %vm920_vm4, %v1106_v47  ;;  %v3622_v0 = vpack.c.bf16 %v866_v53, %v865_v50 }
 0x180   :  { %2929 = vmatprep.mubr.msk.bf16.mxu1 %vm3161_vm0, %v3160_v1  ;;  %v661_v54 = vpop.f32.mrb[80].mxu0 }
 0x181   :  { %v662_v55 = vadd.f32 %v3391_v34, %v661_v54  ;;  %v2779_v56 = vpop.f32.mrb[81].mxu0 }
 0x182   :  { %v664_v58 = vpop.f32.mrb[82].mxu0 }
 0x183   :  { %v867_v59 = vmax.f32 %v662_v55, 0.0  ;;  %v665_v60 = vadd.f32 %v3391_v34, %v664_v58  ;;  %v2780_v61 = vpop.f32.mrb[83].mxu0 }
 0x185   :  { %v868_v63 = vmax.f32 %v665_v60, 0.0 }
 0x187   :  { %2930 = vmatmul.mubr.msk.bf16.vlgmr.msra.gmra.mrb[60].mxu1 %vm920_vm4, %v3567_v62  ;;  %v3634_v11 = vpack.c.bf16 %v868_v63, %v867_v59 }
 0x188   :  { %2950 = vmatpush3.bf16.msra.mxu1 %v1334_v12  ;;  %2933 = vmatprep.mubr.msk.bf16.mxu1 %vm3161_vm0, %v3160_v1  ;;  %v669_v2 = vpop.f32.mrb[84].mxu0 }
 0x189   :  { %2971 = vmatprep.subr.bf16.mxu1 %v3160_v1  ;;  %v670_v3 = vadd.f32 %v3391_v34, %v669_v2  ;;  %v2783_v4 = vpop.f32.mrb[85].mxu0 }
 0x18a   :  { %v672_v5 = vpop.f32.mrb[86].mxu0 }
 0x18b   :  { %v869_v6 = vmax.f32 %v670_v3, 0.0  ;;  %v673_v7 = vadd.f32 %v3391_v34, %v672_v5  ;;  %v2784_v8 = vpop.f32.mrb[87].mxu0 }
 0x18d   :  { %v870_v9 = vmax.f32 %v673_v7, 0.0 }
 0x18f   :  { %2934 = vmatmul.mubr.msk.bf16.gmra.mrb[64].mxu1 %vm920_vm4, %v3578_v10  ;;  %v3643_v62 = vpack.c.bf16 %v870_v9, %v869_v6 }
 0x190   :  { %2937 = vmatprep.mubr.msk.bf16.mxu1 %vm3161_vm0, %v3160_v1  ;;  %v3647_v13 = vpop.f32.mrb[88].mxu0 }
 0x191   :  { %v2787_v15 = vpop.f32.mrb[89].mxu0  ;;  %v678_v8 = vadd.f32 %v3391_v34, %v3647_v13 }
 0x192   :  { %v680_v16 = vpop.f32.mrb[90].mxu0 }
 0x193   :  { %v2788_v17 = vpop.f32.mrb[91].mxu0  ;;  %v681_v18 = vadd.f32 %v3391_v34, %v680_v16 }
 0x195   :  { %v872_v10 = vmax.f32 %v681_v18, 0.0  ;;  %v871_v18 = vmax.f32 %v678_v8, 0.0 }
 0x197   :  { %2938 = vmatmul.mubr.msk.bf16.gmra.mrb[68].mxu1 %vm920_vm4, %v3593_v23  ;;  %v1316_v13 = vpack.c.bf16 %v871_v18, %v871_v18 }
 0x198   :  { %2941 = vmatprep.mubr.msk.bf16.mxu1 %vm3161_vm0, %v3160_v1  ;;  %v685_v19 = vpop.f32.mrb[92].mxu0 }
 0x199   :  { %v686_v20 = vadd.f32 %v3391_v34, %v685_v19  ;;  %v2791_v21 = vpop.f32.mrb[93].mxu0 }
 0x19a   :  { %v688_v22 = vpop.f32.mrb[94].mxu0 }
 0x19b   :  { %v873_v14 = vmax.f32 %v686_v20, 0.0  ;;  %v2792_v24 = vpop.f32.mrb[95].mxu0  ;;  %v689_v28 = vadd.f32 %v3391_v34, %v688_v22 }
 0x19d   :  { %v3657_v27 = vpack.c.bf16 %v873_v14, %v872_v10  ;;  %v874_v31 = vmax.f32 %v689_v28, 0.0 }
 0x19f   :  { %2942 = vmatmul.mubr.msk.bf16.gmra.mrb[72].mxu1 %vm920_vm4, %v3603_v44 }
 0x1a0   :  { %2945 = vmatprep.mubr.msk.bf16.mxu1 %vm3161_vm0, %v3160_v1  ;;  %v693_v23 = vpop.f32.mrb[96].mxu0 }
 0x1a1   :  { %v694_v32 = vadd.f32 %v3391_v34, %v693_v23  ;;  %v2795_v26 = vpop.f32.mrb[97].mxu0 }
 0x1a2   :  { %v696_v33 = vpop.f32.mrb[98].mxu0 }
 0x1a3   :  { %v875_v35 = vmax.f32 %v694_v32, 0.0  ;;  %v2796_v37 = vpop.f32.mrb[99].mxu0  ;;  %v697_v39 = vadd.f32 %v3391_v34, %v696_v33 }
 0x1a5   :  { %v3665_v38 = vpack.c.bf16 %v875_v35, %v874_v31  ;;  %v876_v40 = vmax.f32 %v697_v39, 0.0  ;;  %v1527_v31 = vld [vmem:[%s4002_s3 + $0x18] sm:$0xf] }
 0x1a6   :  { %v1544_v37 = vsel %vm936_vm3, %v1527_v31, 0 }
 0x1a7   :  { %2946 = vmatmul.mubr.msk.bf16.gmra.mrb[76].mxu1 %vm920_vm4, %v1211_v30 }
 0x1a8   :  { %2951 = vmatprep.mubr.msk.bf16.mxu1 %vm3161_vm0, %v3160_v1  ;;  %v701_v44 = vpop.f32.mrb[100].mxu0 }
 0x1a9   :  { %v702_v41 = vadd.f32 %v3391_v34, %v701_v44  ;;  %v2799_v42 = vpop.f32.mrb[101].mxu0 }
 0x1aa   :  { %v704_v45 = vpop.f32.mrb[102].mxu0 }
 0x1ab   :  { %v877_v46 = vmax.f32 %v702_v41, 0.0  ;;  %v2800_v48 = vpop.f32.mrb[103].mxu0  ;;  %v705_v50 = vadd.f32 %v3391_v34, %v704_v45 }
 0x1ad   :  { %v3676_v47 = vpack.c.bf16 %v877_v46, %v876_v40  ;;  %v878_v52 = vmax.f32 %v705_v50, 0.0 }
 0x1af   :  { %2952 = vmatmul.mubr.msk.bf16.vlgmr.msra.gmra.mrb[80].mxu1 %vm920_vm4, %v3615_v36 }
 0x1b0   :  { %2972 = vmatpush3.bf16.msra.mxu1 %v1439_v49  ;;  %2955 = vmatprep.mubr.msk.bf16.mxu1 %vm3161_vm0, %v3160_v1  ;;  %v709_v51 = vpop.f32.mrb[104].mxu0 }
 0x1b1   :  { %2993 = vmatprep.subr.bf16.mxu1 %v3160_v1  ;;  %v710_v53 = vadd.f32 %v3391_v34, %v709_v51  ;;  %v2803_v54 = vpop.f32.mrb[105].mxu0 }
 0x1b2   :  { %v3685_v55 = vpop.f32.mrb[106].mxu0 }
 0x1b3   :  { %v879_v56 = vmax.f32 %v710_v53, 0.0  ;;  %v2804_v57 = vpop.f32.mrb[107].mxu0 }
 0x1b5   :  { %v3687_v58 = vpack.c.bf16 %v879_v56, %v878_v52 }
 0x1b7   :  { %2956 = vmatmul.mubr.msk.bf16.gmra.mrb[84].mxu1 %vm920_vm4, %v3622_v0 }
 0x1b8   :  { %2959 = vmatprep.mubr.msk.bf16.mxu1 %vm3161_vm0, %v3160_v1  ;;  %v717_v36 = vpop.f32.mrb[108].mxu0 }
 0x1b9   :  { %v718_v59 = vadd.f32 %v3391_v34, %v717_v36  ;;  %v2807_v60 = vpop.f32.mrb[109].mxu0 }
 0x1ba   :  { %v720_v61 = vpop.f32.mrb[110].mxu0 }
 0x1bb   :  { %v881_v12 = vmax.f32 %v718_v59, 0.0  ;;  %v721_v63 = vadd.f32 %v3391_v34, %v720_v61  ;;  %v2808_v2 = vpop.f32.mrb[111].mxu0 }
 0x1bd   :  { %v882_v3 = vmax.f32 %v721_v63, 0.0 }
 0x1bf   :  { %2960 = vmatmul.mubr.msk.bf16.gmra.mrb[88].mxu1 %vm920_vm4, %v3634_v11  ;;  %v3697_v4 = vpack.c.bf16 %v882_v3, %v881_v12 }
 0x1c0   :  { %2963 = vmatprep.mubr.msk.bf16.mxu1 %vm3161_vm0, %v3160_v1  ;;  %v725_v0 = vpop.f32.mrb[112].mxu0 }
 0x1c1   :  { %v726_v5 = vadd.f32 %v3391_v34, %v725_v0  ;;  %v2811_v6 = vpop.f32.mrb[113].mxu0 }
 0x1c2   :  { %v728_v7 = vpop.f32.mrb[114].mxu0  ;;  %v713_v6 = vadd.f32 %v3391_v34, %v3685_v55 }
 0x1c3   :  { %v883_v9 = vmax.f32 %v726_v5, 0.0  ;;  %v729_v15 = vadd.f32 %v3391_v34, %v728_v7  ;;  %v2812_v16 = vpop.f32.mrb[115].mxu0 }
 0x1c5   :  { %v884_v17 = vmax.f32 %v729_v15, 0.0  ;;  %v880_v15 = vmax.f32 %v713_v6, 0.0 }
 0x1c7   :  { %2964 = vmatmul.mubr.msk.bf16.gmra.mrb[92].mxu1 %vm920_vm4, %v3643_v62  ;;  %v3707_v11 = vpack.c.bf16 %v884_v17, %v883_v9 }
 0x1c8   :  { %2967 = vmatprep.mubr.msk.bf16.mxu1 %vm3161_vm0, %v3160_v1  ;;  %v733_v19 = vpop.f32.mrb[116].mxu0 }
 0x1c9   :  { %v734_v10 = vadd.f32 %v3391_v34, %v733_v19  ;;  %v2815_v20 = vpop.f32.mrb[117].mxu0 }
 0x1ca   :  { %v736_v21 = vpop.f32.mrb[118].mxu0 }
 0x1cb   :  { %v885_v22 = vmax.f32 %v734_v10, 0.0  ;;  %v737_v14 = vadd.f32 %v3391_v34, %v736_v21  ;;  %v2816_v24 = vpop.f32.mrb[119].mxu0 }
 0x1cd   :  { %v886_v25 = vmax.f32 %v737_v14, 0.0 }
 0x1cf   :  { %2968 = vmatmul.mubr.msk.bf16.gmra.mrb[96].mxu1 %vm920_vm4, %v1316_v13  ;;  %v3714_v28 = vpack.c.bf16 %v886_v25, %v885_v22  ;;  %v1421_v22 = vpack.c.bf16 %v880_v15, %v880_v15 }
 0x1d0   :  { %2973 = vmatprep.mubr.msk.bf16.mxu1 %vm3161_vm0, %v3160_v1  ;;  %v741_v62 = vpop.f32.mrb[120].mxu0 }
 0x1d1   :  { %v742_v23 = vadd.f32 %v3391_v34, %v741_v62  ;;  %v2819_v29 = vpop.f32.mrb[121].mxu0 }
 0x1d2   :  { %v744_v32 = vpop.f32.mrb[122].mxu0 }
 0x1d3   :  { %v887_v26 = vmax.f32 %v742_v23, 0.0  ;;  %v745_v33 = vadd.f32 %v3391_v34, %v744_v32  ;;  %v2820_v35 = vpop.f32.mrb[123].mxu0  ;;  %v1632_v32 = vld [vmem:[%s4002_s3 + $0x1c] sm:$0xf] }
 0x1d5   :  { %v888_v30 = vmax.f32 %v745_v33, 0.0 }
 0x1d7   :  { %2974 = vmatmul.mubr.msk.bf16.vlgmr.msra.gmra.mrb[100].mxu1 %vm920_vm4, %v3657_v27  ;;  %v3726_v39 = vpack.c.bf16 %v888_v30, %v887_v26 }
 0x1d8   :  { %2994 = vmatpush3.bf16.msra.mxu1 %v1544_v37  ;;  %2977 = vmatprep.mubr.msk.bf16.mxu1 %vm3161_vm0, %v3160_v1  ;;  %v3730_v44 = vpop.f32.mrb[124].mxu0 }
 0x1d9   :  { %3015 = vmatprep.subr.bf16.mxu1 %v3160_v1  ;;  %v2823_v40 = vpop.f32.mrb[125].mxu0 }
 0x1da   :  { %v752_v41 = vpop.f32.mrb[126].mxu0 }
 0x1db   :  { %v2824_v42 = vpop.f32.mrb[127].mxu0  ;;  %v753_v43 = vadd.f32 %v3391_v34, %v752_v41  ;;  %v1649_v41 = vsel %vm936_vm3, %v1632_v32, 0 }
 0x1dd   :  { %v890_v45 = vmax.f32 %v753_v43, 0.0 }
 0x1df   :  { %2978 = vmatmul.mubr.msk.bf16.gmra.mrb[104].mxu1 %vm920_vm4, %v3665_v38 }
 0x1e0   :  { %2981 = vmatprep.mubr.msk.bf16.mxu1 %vm3161_vm0, %v3160_v1  ;;  %v757_v27 = vpop.f32.mrb[128].mxu0 }
 0x1e1   :  { %v758_v46 = vadd.f32 %v3391_v34, %v757_v27  ;;  %v2827_v48 = vpop.f32.mrb[129].mxu0 }
 0x1e2   :  { %v3739_v49 = vpop.f32.mrb[0].mxu1  ;;  %v760_v50 = vpop.f32.mrb[130].mxu0 }
 0x1e3   :  { %v2865_v51 = vpop.f32.mrb[1].mxu1  ;;  %v891_v52 = vmax.f32 %v758_v46, 0.0  ;;  %v2828_v53 = vpop.f32.mrb[131].mxu0  ;;  %v761_v38 = vadd.f32 %v3391_v34, %v760_v50 }
 0x1e4   :  { %v3741_v54 = vpop.f32.mrb[2].mxu1 }
 0x1e5   :  { %v2866_v56 = vpop.f32.mrb[3].mxu1  ;;  %v3743_v57 = vpack.c.bf16 %v891_v52, %v890_v45  ;;  %v892_v59 = vmax.f32 %v761_v38, 0.0 }
 0x1e7   :  { %2982 = vmatmul.mubr.msk.bf16.gmra.mrb[108].mxu1 %vm920_vm4, %v3676_v47 }
 0x1e8   :  { %2985 = vmatprep.mubr.msk.bf16.mxu1 %vm3161_vm0, %v3160_v1  ;;  %v765_v36 = vpop.f32.mrb[132].mxu0 }
 0x1e9   :  { %v766_v60 = vadd.f32 %v3391_v34, %v765_v36  ;;  %v2831_v61 = vpop.f32.mrb[133].mxu0 }
 0x1ea   :  { %v3751_v12 = vpop.f32.mrb[4].mxu1  ;;  %v768_v63 = vpop.f32.mrb[134].mxu0 }
 0x1eb   :  { %v2869_v2 = vpop.f32.mrb[5].mxu1  ;;  %v893_v3 = vmax.f32 %v766_v60, 0.0  ;;  %v2832_v0 = vpop.f32.mrb[135].mxu0  ;;  %v769_v8 = vadd.f32 %v3391_v34, %v768_v63 }
 0x1ec   :  { %v3753_v5 = vpop.f32.mrb[6].mxu1 }
 0x1ed   :  { %v2870_v47 = vpop.f32.mrb[7].mxu1  ;;  %v3757_v7 = vpack.c.bf16 %v893_v3, %v892_v59  ;;  %v894_v16 = vmax.f32 %v769_v8, 0.0 }
 0x1ef   :  { %2986 = vmatmul.mubr.msk.bf16.gmra.mrb[112].mxu1 %vm920_vm4, %v3687_v58 }
 0x1f0   :  { %2989 = vmatprep.mubr.msk.bf16.mxu1 %vm3161_vm0, %v3160_v1  ;;  %v773_v9 = vpop.f32.mrb[136].mxu0 }
 0x1f1   :  { %v774_v17 = vadd.f32 %v3391_v34, %v773_v9  ;;  %v2835_v18 = vpop.f32.mrb[137].mxu0 }
 0x1f2   :  { %v3765_v19 = vpop.f32.mrb[8].mxu1  ;;  %v776_v55 = vpop.f32.mrb[138].mxu0 }
 0x1f3   :  { %v2873_v10 = vpop.f32.mrb[9].mxu1  ;;  %v895_v20 = vmax.f32 %v774_v17, 0.0  ;;  %v2836_v21 = vpop.f32.mrb[139].mxu0  ;;  %v777_v24 = vadd.f32 %v3391_v34, %v776_v55 }
 0x1f4   :  { %v3767_v13 = vpop.f32.mrb[10].mxu1 }
 0x1f5   :  { %v2874_v14 = vpop.f32.mrb[11].mxu1  ;;  %v3769_v58 = vpack.c.bf16 %v895_v20, %v894_v16  ;;  %v896_v62 = vmax.f32 %v777_v24, 0.0 }
 0x1f7   :  { %2990 = vmatmul.mubr.msk.bf16.gmra.mrb[116].mxu1 %vm920_vm4, %v1421_v22  ;;  %v3824_v22 = vld [vmem:[%s4001_s2] ss:$0 sm:$0xff] }
 0x1f8   :  { %2995 = vmatprep.mubr.msk.bf16.mxu1 %vm3161_vm0, %v3160_v1  ;;  %v781_v25 = vpop.f32.mrb[140].mxu0 }
 0x1f9   :  { %v782_v23 = vadd.f32 %v3391_v34, %v781_v25  ;;  %v2839_v29 = vpop.f32.mrb[141].mxu0 }
 0x1fa   :  { %v3776_v31 = vpop.f32.mrb[12].mxu1  ;;  %v3781_v26 = vpop.f32.mrb[142].mxu0 }
 0x1fb   :  { %v2877_v33 = vpop.f32.mrb[13].mxu1  ;;  %v897_v35 = vmax.f32 %v782_v23, 0.0  ;;  %v2840_v37 = vpop.f32.mrb[143].mxu0 }
 0x1fc   :  { %v3783_v30 = vpop.f32.mrb[14].mxu1 }
 0x1fd   :  { %v2878_v40 = vpop.f32.mrb[15].mxu1  ;;  %v3786_v42 = vpack.c.bf16 %v897_v35, %v896_v62 }
 0x1ff   :  { %2996 = vmatmul.mubr.msk.bf16.vlgmr.msra.gmra.mrb[120].mxu1 %vm920_vm4, %v3697_v4 }
 0x200   :  { %3016 = vmatpush3.bf16.msra.mxu1 %v1649_v41  ;;  %2999 = vmatprep.mubr.msk.bf16.mxu1 %vm3161_vm0, %v3160_v1  ;;  %v789_v43 = vpop.f32.mrb[144].mxu0 }
 0x201   :  { %3037 = vmatprep.subr.bf16.mxu1 %v3160_v1  ;;  %v790_v27 = vadd.f32 %v3391_v34, %v789_v43  ;;  %v2843_v45 = vpop.f32.mrb[145].mxu0 }
 0x202   :  { %v3794_v46 = vpop.f32.mrb[16].mxu1  ;;  %v792_v48 = vpop.f32.mrb[146].mxu0 }
 0x203   :  { %v2881_v50 = vpop.f32.mrb[17].mxu1  ;;  %v899_v51 = vmax.f32 %v790_v27, 0.0  ;;  %v793_v52 = vadd.f32 %v3391_v34, %v792_v48  ;;  %v2844_v53 = vpop.f32.mrb[147].mxu0 }
 0x204   :  { %v1009_v56 = vpop.f32.mrb[18].mxu1 }
 0x205   :  { %v2882_v4 = vpop.f32.mrb[19].mxu1  ;;  %v900_v38 = vmax.f32 %v793_v52, 0.0 }
 0x207   :  { %3000 = vmatmul.mubr.msk.bf16.gmra.mrb[124].mxu1 %vm920_vm4, %v3707_v11  ;;  %v3799_v36 = vpack.c.bf16 %v900_v38, %v899_v51  ;;  %v1737_v38 = vld [vmem:[%s4002_s3 + $0x20] sm:$0xf] }
 0x208   :  { %3003 = vmatprep.mubr.msk.bf16.mxu1 %vm3161_vm0, %v3160_v1  ;;  %v797_v59 = vpop.f32.mrb[148].mxu0 }
 0x209   :  { %v798_v60 = vadd.f32 %v3391_v34, %v797_v59  ;;  %v2847_v61 = vpop.f32.mrb[149].mxu0 }
 0x20a   :  { %v1064_v63 = vpop.f32.mrb[20].mxu1  ;;  %v800_v2 = vpop.f32.mrb[150].mxu0 }
 0x20b   :  { %v3805_v3 = vadd.f32 %v1064_v63, %v3739_v49  ;;  %v2887_v0 = vpop.f32.mrb[21].mxu1  ;;  %v901_v6 = vmax.f32 %v798_v60, 0.0  ;;  %v801_v47 = vadd.f32 %v3391_v34, %v800_v2  ;;  %v2848_v8 = vpop.f32.mrb[151].mxu0 }
 0x20c   :  { %v1067_v11 = vpop.f32.mrb[22].mxu1 }
 0x20d   :  { %v3809_v9 = vadd.f32 %v1067_v11, %v3741_v54  ;;  %v2888_v15 = vpop.f32.mrb[23].mxu1  ;;  %v902_v16 = vmax.f32 %v801_v47, 0.0 }
 0x20f   :  { %3004 = vmatmul.mubr.msk.bf16.gmra.mrb[128].mxu1 %vm920_vm4, %v3714_v28  ;;  %v3813_v17 = vpack.c.bf16 %v902_v16, %v901_v6  ;;  %v750_v28 = vadd.f32 %v3824_v22, %v3730_v44  ;;  %v1754_v6 = vsel %vm936_vm3, %v1737_v38, 0 }
 0x210   :  { %3007 = vmatprep.mubr.msk.bf16.mxu1 %vm3161_vm0, %v3160_v1  ;;  %v805_v49 = vpop.f32.mrb[152].mxu0 }
 0x211   :  { %v806_v18 = vadd.f32 %v3391_v34, %v805_v49  ;;  %v2851_v55 = vpop.f32.mrb[153].mxu0 }
 0x212   :  { %v1072_v10 = vpop.f32.mrb[24].mxu1  ;;  %v808_v20 = vpop.f32.mrb[154].mxu0 }
 0x213   :  { %v3819_v21 = vadd.f32 %v1072_v10, %v3751_v12  ;;  %v2891_v54 = vpop.f32.mrb[25].mxu1  ;;  %v903_v14 = vmax.f32 %v806_v18, 0.0  ;;  %v809_v24 = vadd.f32 %v3824_v22, %v808_v20  ;;  %v2852_v25 = vpop.f32.mrb[155].mxu0  ;;  %v889_v12 = vmax.f32 %v750_v28, 0.0 }
 0x214   :  { %v1075_v34 = vpop.f32.mrb[26].mxu1  ;;  %v785_v54 = vadd.f32 %v3824_v22, %v3781_v26 }
 0x215   :  { %v1076_v62 = vadd.f32 %v1075_v34, %v3753_v5  ;;  %v2892_v23 = vpop.f32.mrb[27].mxu1  ;;  %v904_v29 = vmax.f32 %v809_v24, 0.0  ;;  %v1526_v41 = vpack.c.bf16 %v889_v12, %v889_v12 }
 0x217   :  { %3008 = vmatmul.mubr.msk.bf16.gmra.mrb[132].mxu1 %vm920_vm4, %v3726_v39  ;;  %v3832_v32 = vpack.c.bf16 %v904_v29, %v903_v14 }
 0x218   :  { %3011 = vmatprep.mubr.msk.bf16.mxu1 %vm3161_vm0, %v3160_v1  ;;  %v813_v33 = vpop.f32.mrb[156].mxu0 }
 0x219   :  { %v814_v44 = vadd.f32 %v3824_v22, %v813_v33  ;;  %v2855_v35 = vpop.f32.mrb[157].mxu0 }
 0x21a   :  { %v1080_v37 = vpop.f32.mrb[28].mxu1  ;;  %v816_v40 = vpop.f32.mrb[158].mxu0 }
 0x21b   :  { %v1081_v5 = vadd.f32 %v1080_v37, %v3765_v19  ;;  %v2895_v43 = vpop.f32.mrb[29].mxu1  ;;  %v905_v27 = vmax.f32 %v814_v44, 0.0  ;;  %v817_v45 = vadd.f32 %v3824_v22, %v816_v40  ;;  %v2856_v48 = vpop.f32.mrb[159].mxu0 }
 0x21c   :  { %v1083_v39 = vpop.f32.mrb[30].mxu1 }
 0x21d   :  { %v1084_v50 = vadd.f32 %v1083_v39, %v3767_v13  ;;  %v2896_v51 = vpop.f32.mrb[31].mxu1  ;;  %v906_v52 = vmax.f32 %v817_v45, 0.0 }
 0x21f   :  { %3012 = vmatmul.mubr.msk.bf16.gmra.mrb[136].mxu1 %vm920_vm4, %v1526_v41  ;;  %v3841_v53 = vpack.c.bf16 %v906_v52, %v905_v27 }
 0x220   :  { %3017 = vmatprep.mubr.msk.bf16.mxu1 %vm3161_vm0, %v3160_v1  ;;  %v3845_v56 = vpop.f32.mrb[160].mxu0 }
 0x221   :  { %v2859_v19 = vpop.f32.mrb[161].mxu0 }
 0x222   :  { %v1088_v4 = vpop.f32.mrb[32].mxu1  ;;  %v824_v59 = vpop.f32.mrb[162].mxu0 }
 0x223   :  { %v1089_v13 = vadd.f32 %v1088_v4, %v3776_v31  ;;  %v2899_v60 = vpop.f32.mrb[33].mxu1  ;;  %v2860_v61 = vpop.f32.mrb[163].mxu0 }
 0x224   :  { %v1091_v63 = vpop.f32.mrb[34].mxu1 }
 0x225   :  { %v1092_v2 = vadd.f32 %v1091_v63, %v3783_v30  ;;  %v2900_v0 = vpop.f32.mrb[35].mxu1 }
 0x227   :  { %3018 = vmatmul.mubr.msk.bf16.vlgmr.msra.gmra.mrb[140].mxu1 %vm920_vm4, %v3743_v57 }
 0x228   :  { %3038 = vmatpush3.bf16.msra.mxu1 %v1754_v6  ;;  %3021 = vmatprep.mubr.msk.bf16.mxu1 %vm3161_vm0, %v3160_v1 }
 0x22a   :  { %v1096_v47 = vpop.f32.mrb[36].mxu1 }
 0x22b   :  { %v1097_v8 = vadd.f32 %v1096_v47, %v3794_v46  ;;  %v2903_v11 = vpop.f32.mrb[37].mxu1 }
 0x22c   :  { %v1099_v31 = vpop.f32.mrb[38].mxu1 }
 0x22d   :  { %v2904_v15 = vpop.f32.mrb[39].mxu1 }
 0x22f   :  { %3022 = vmatmul.mubr.msk.bf16.gmra.mrb[144].mxu1 %vm920_vm4, %v3757_v7 }
 0x230   :  { %3025 = vmatprep.mubr.msk.bf16.mxu1 %vm3161_vm0, %v3160_v1 }
 0x232   :  { %v1160_v30 = vpop.f32.mrb[40].mxu1 }
 0x233   :  { %v1198_v16 = vadd.f32 %v1160_v30, %v3805_v3  ;;  %v2909_v57 = vpop.f32.mrb[41].mxu1 }
 0x234   :  { %v1163_v49 = vpop.f32.mrb[42].mxu1 }
 0x235   :  { %v1199_v18 = vadd.f32 %v1163_v49, %v3809_v9  ;;  %v2910_v55 = vpop.f32.mrb[43].mxu1 }
 0x237   :  { %3026 = vmatmul.mubr.msk.bf16.gmra.mrb[148].mxu1 %vm920_vm4, %v3769_v58  ;;  %v898_v58 = vmax.f32 %v785_v54, 0.0 }
 0x238   :  { %3029 = vmatprep.mubr.msk.bf16.mxu1 %vm3161_vm0, %v3160_v1 }
 0x239   :  { %v1631_v34 = vpack.c.bf16 %v898_v58, %v898_v58 }
 0x23a   :  { %v1168_v46 = vpop.f32.mrb[44].mxu1 }
 0x23b   :  { %v1200_v7 = vadd.f32 %v1168_v46, %v3819_v21  ;;  %v2913_v10 = vpop.f32.mrb[45].mxu1 }
 0x23c   :  { %v1171_v20 = vpop.f32.mrb[46].mxu1 }
 0x23d   :  { %v1201_v3 = vadd.f32 %v1171_v20, %v1076_v62  ;;  %v2914_v28 = vpop.f32.mrb[47].mxu1 }
 0x23f   :  { %3030 = vmatmul.mubr.msk.bf16.gmra.mrb[152].mxu1 %vm920_vm4, %v3786_v42 }
 0x240   :  { %3033 = vmatprep.mubr.msk.bf16.mxu1 %vm3161_vm0, %v3160_v1 }
 0x242   :  { %v1176_v9 = vpop.f32.mrb[48].mxu1 }
 0x243   :  { %v1202_v14 = vadd.f32 %v1176_v9, %v1081_v5  ;;  %v2917_v24 = vpop.f32.mrb[49].mxu1 }
 0x244   :  { %v1179_v25 = vpop.f32.mrb[50].mxu1 }
 0x245   :  { %v1203_v21 = vadd.f32 %v1179_v25, %v1084_v50  ;;  %v2918_v23 = vpop.f32.mrb[51].mxu1 }
 0x247   :  { %3034 = vmatmul.mubr.msk.bf16.gmra.mrb[156].mxu1 %vm920_vm4, %v1631_v34 }
 0x248   :  { %3039 = vmatprep.mubr.msk.bf16.mxu1 %vm3161_vm0, %v3160_v1 }
 0x24a   :  { %v1184_v26 = vpop.f32.mrb[52].mxu1 }
 0x24b   :  { %v1204_v62 = vadd.f32 %v1184_v26, %v1089_v13  ;;  %v2921_v29 = vpop.f32.mrb[53].mxu1 }
 0x24c   :  { %v1187_v42 = vpop.f32.mrb[54].mxu1 }
 0x24d   :  { %v1205_v12 = vadd.f32 %v1187_v42, %v1092_v2  ;;  %v2922_v33 = vpop.f32.mrb[55].mxu1  ;;  %v3111_v42 = vld [vmem:[%s4004_s5 + $0x40] ss:$8 sps:$4 sm:$0xff]  }
 0x24f   :  { %3040 = vmatmul.mubr.msk.bf16.vlgmr.msra.gmra.mrb[160].mxu1 %vm920_vm4, %v3799_v36 }
 0x250   :  { %3043 = vmatprep.mubr.msk.bf16.mxu1 %vm3161_vm0, %v3160_v1 }
 0x252   :  { %v1192_v44 = vpop.f32.mrb[56].mxu1 }
 0x253   :  { %v1206_v35 = vadd.f32 %v1192_v44, %v1097_v8  ;;  %v2925_v37 = vpop.f32.mrb[57].mxu1 }
 0x254   :  { %v1195_v40 = vpop.f32.mrb[58].mxu1 }
 0x255   :  { %v2926_v41 = vpop.f32.mrb[59].mxu1 }
 0x257   :  { %3044 = vmatmul.mubr.msk.bf16.gmra.mrb[164].mxu1 %vm920_vm4, %v3813_v17  ;;  %v822_v17 = vadd.f32 %v3824_v22, %v3845_v56 }
 0x258   :  { %3047 = vmatprep.mubr.msk.bf16.mxu1 %vm3161_vm0, %v3160_v1 }
 0x259   :  { %v907_v38 = vmax.f32 %v822_v17, 0.0 }
 0x25a   :  { %v1265_v5 = vpop.f32.mrb[60].mxu1 }
 0x25b   :  { %v1303_v43 = vadd.f32 %v1265_v5, %v1198_v16  ;;  %v2931_v27 = vpop.f32.mrb[61].mxu1  ;;  %v1736_v59 = vpack.c.bf16 %v907_v38, %v907_v38 }
 0x25c   :  { %v1268_v45 = vpop.f32.mrb[62].mxu1 }
 0x25d   :  { %v1304_v48 = vadd.f32 %v1268_v45, %v1199_v18  ;;  %v2932_v36 = vpop.f32.mrb[63].mxu1  ;;  %v3162_v45 = vmov 0  }
 0x25e   :  { %1914 = vmatprep.mubr.bf16.mxu0 %v3162_v45 }
 0x25f   :  { %3048 = vmatmul.mubr.msk.bf16.gmra.mrb[168].mxu1 %vm920_vm4, %v3832_v32 }
 0x260   :  { %3051 = vmatprep.mubr.msk.bf16.mxu1 %vm3161_vm0, %v3160_v1 }
 0x262   :  { %v1273_v39 = vpop.f32.mrb[64].mxu1 }
 0x263   :  { %v1305_v50 = vadd.f32 %v1273_v39, %v1200_v7  ;;  %v2935_v51 = vpop.f32.mrb[65].mxu1  ;;  %v3116_v39 = vld [vmem:[%s4004_s5 + $0x4] ss:$8 sps:$4 sm:$0xff]  }
 0x264   :  { %v1276_v52 = vpop.f32.mrb[66].mxu1  ;;  %1936 = vmatprep.subr.bf16.mxu0 %v3116_v39 }
 0x265   :  { %v1306_v19 = vadd.f32 %v1276_v52, %v1201_v3  ;;  %v2936_v4 = vpop.f32.mrb[67].mxu1 }
 0x267   :  { %3052 = vmatmul.mubr.msk.bf16.gmra.mrb[172].mxu1 %vm920_vm4, %v3841_v53 }
 0x268   :  { %3055 = vmatprep.mubr.msk.bf16.mxu1 %vm3161_vm0, %v3160_v1 }
 0x26a   :  { %v1281_v32 = vpop.f32.mrb[68].mxu1 }
 0x26b   :  { %v1307_v13 = vadd.f32 %v1281_v32, %v1202_v14  ;;  %v2939_v60 = vpop.f32.mrb[69].mxu1 }
 0x26c   :  { %v1284_v61 = vpop.f32.mrb[70].mxu1 }
 0x26d   :  { %v1308_v63 = vadd.f32 %v1284_v61, %v1203_v21  ;;  %v2940_v2 = vpop.f32.mrb[71].mxu1 }
 0x26f   :  { %3056 = vmatmul.mubr.msk.bf16.gmra.mrb[176].mxu1 %vm920_vm4, %v1736_v59 }
 0x270   :  { %2143 = vmatprep.mubr.bf16.mxu1 %v3162_v45 }
 0x272   :  { %v1289_v22 = vpop.f32.mrb[72].mxu1 }
 0x273   :  { %v1309_v56 = vadd.f32 %v1289_v22, %v1204_v62  ;;  %v2943_v0 = vpop.f32.mrb[73].mxu1 }
 0x274   :  { %v1292_v6 = vpop.f32.mrb[74].mxu1 }
 0x275   :  { %v1310_v47 = vadd.f32 %v1292_v6, %v1205_v12  ;;  %v2944_v8 = vpop.f32.mrb[75].mxu1  ;;  %v3113_v12 = vld [vmem:[%s4004_s5 + $0x44] ss:$8 sps:$4 sm:$0xff]  }
 0x276   :  { %2111 = vmatprep.subr.bf16.mxu1 %v3113_v12 }
 0x277   :  { %2112 = vmatpush1.bf16.msra.mxu1 %v3111_v42 }
 0x27a   :  { %v1297_v53 = vpop.f32.mrb[76].mxu1 }
 0x27b   :  { %v1311_v11 = vadd.f32 %v1297_v53, %v1206_v35  ;;  %v2947_v31 = vpop.f32.mrb[77].mxu1 }
 0x27c   :  { %v1300_v15 = vpop.f32.mrb[78].mxu1 }
 0x27d   :  { %v2948_v1 = vpop.f32.mrb[79].mxu1 }
 0x282   :  { %v1370_v30 = vpop.f32.mrb[80].mxu1 }
 0x283   :  { %v1408_v16 = vadd.f32 %v1370_v30, %v1303_v43  ;;  %v2953_v57 = vpop.f32.mrb[81].mxu1 }
 0x284   :  { %v1373_v49 = vpop.f32.mrb[82].mxu1 }
 0x285   :  { %v1409_v18 = vadd.f32 %v1373_v49, %v1304_v48  ;;  %v2954_v55 = vpop.f32.mrb[83].mxu1 }
 0x28a   :  { %v1378_v46 = vpop.f32.mrb[84].mxu1 }
 0x28b   :  { %v1410_v7 = vadd.f32 %v1378_v46, %v1305_v50  ;;  %v2957_v10 = vpop.f32.mrb[85].mxu1 }
 0x28c   :  { %v1381_v20 = vpop.f32.mrb[86].mxu1 }
 0x28d   :  { %v1411_v54 = vadd.f32 %v1381_v20, %v1306_v19  ;;  %v2958_v3 = vpop.f32.mrb[87].mxu1 }
 0x292   :  { %v1386_v28 = vpop.f32.mrb[88].mxu1 }
 0x293   :  { %v1412_v58 = vadd.f32 %v1386_v28, %v1307_v13  ;;  %v2961_v9 = vpop.f32.mrb[89].mxu1 }
 0x294   :  { %v1389_v14 = vpop.f32.mrb[90].mxu1 }
 0x295   :  { %v1413_v24 = vadd.f32 %v1389_v14, %v1308_v63  ;;  %v2962_v25 = vpop.f32.mrb[91].mxu1  ;;  %v3125_v63 = vld [vmem:[%s4004_s5 + $0x64] ss:$8 sps:$4 sm:$0xff]  }
 0x296   :  { %2229 = vmatprep.subr.bf16.mxu1 %v3125_v63 }
 0x29a   :  { %v1394_v34 = vpop.f32.mrb[92].mxu1 }
 0x29b   :  { %v1414_v21 = vadd.f32 %v1394_v34, %v1309_v56  ;;  %v2965_v23 = vpop.f32.mrb[93].mxu1 }
 0x29c   :  { %v1397_v26 = vpop.f32.mrb[94].mxu1 }
 0x29d   :  { %v1415_v62 = vadd.f32 %v1397_v26, %v1310_v47  ;;  %v2966_v29 = vpop.f32.mrb[95].mxu1 }
 0x2a2   :  { %v1402_v33 = vpop.f32.mrb[96].mxu1 }
 0x2a3   :  { %v1416_v44 = vadd.f32 %v1402_v33, %v1311_v11  ;;  %v2969_v35 = vpop.f32.mrb[97].mxu1 }
 0x2a4   :  { %v1405_v37 = vpop.f32.mrb[98].mxu1 }
 0x2a5   :  { %v2970_v40 = vpop.f32.mrb[99].mxu1 }
 0x2aa   :  { %v1475_v41 = vpop.f32.mrb[100].mxu1 }
 0x2ab   :  { %v1513_v5 = vadd.f32 %v1475_v41, %v1408_v16  ;;  %v2975_v43 = vpop.f32.mrb[101].mxu1 }
 0x2ac   :  { %v1478_v27 = vpop.f32.mrb[102].mxu1 }
 0x2ad   :  { %v1514_v48 = vadd.f32 %v1478_v27, %v1409_v18  ;;  %v2976_v36 = vpop.f32.mrb[103].mxu1 }
 0x2b2   :  { %v1483_v50 = vpop.f32.mrb[104].mxu1 }
 0x2b3   :  { %v1515_v51 = vadd.f32 %v1483_v50, %v1410_v7  ;;  %v2979_v17 = vpop.f32.mrb[105].mxu1 }
 0x2b4   :  { %v1486_v52 = vpop.f32.mrb[106].mxu1 }
 0x2b5   :  { %v1516_v19 = vadd.f32 %v1486_v52, %v1411_v54  ;;  %v2980_v4 = vpop.f32.mrb[107].mxu1 }
 0x2ba   :  { %v1491_v38 = vpop.f32.mrb[108].mxu1 }
 0x2bb   :  { %v1517_v32 = vadd.f32 %v1491_v38, %v1412_v58  ;;  %v2983_v59 = vpop.f32.mrb[109].mxu1 }
 0x2bc   :  { %v1494_v13 = vpop.f32.mrb[110].mxu1 }
 0x2bd   :  { %v1518_v60 = vadd.f32 %v1494_v13, %v1413_v24  ;;  %v2984_v61 = vpop.f32.mrb[111].mxu1 }
 0x2c2   :  { %v1499_v2 = vpop.f32.mrb[112].mxu1 }
 0x2c3   :  { %v1519_v22 = vadd.f32 %v1499_v2, %v1414_v21  ;;  %v2987_v56 = vpop.f32.mrb[113].mxu1 }
 0x2c4   :  { %v1502_v0 = vpop.f32.mrb[114].mxu1 }
 0x2c5   :  { %v1520_v6 = vadd.f32 %v1502_v0, %v1415_v62  ;;  %v2988_v47 = vpop.f32.mrb[115].mxu1 }
 0x2ca   :  { %v1507_v8 = vpop.f32.mrb[116].mxu1 }
 0x2cb   :  { %v1521_v53 = vadd.f32 %v1507_v8, %v1416_v44  ;;  %v2991_v11 = vpop.f32.mrb[117].mxu1 }
 0x2cc   :  { %v1510_v31 = vpop.f32.mrb[118].mxu1 }
 0x2cd   :  { %v2992_v15 = vpop.f32.mrb[119].mxu1 }
 0x2d2   :  { %v1580_v1 = vpop.f32.mrb[120].mxu1 }
 0x2d3   :  { %v1618_v30 = vadd.f32 %v1580_v1, %v1513_v5  ;;  %v2997_v16 = vpop.f32.mrb[121].mxu1 }
 0x2d4   :  { %v1583_v57 = vpop.f32.mrb[122].mxu1 }
 0x2d5   :  { %v1619_v49 = vadd.f32 %v1583_v57, %v1514_v48  ;;  %v2998_v18 = vpop.f32.mrb[123].mxu1 }
 0x2d6   :  { %v3114_v18 = vld [vmem:[%s4004_s5] ss:$8 sps:$4 sm:$0xff]  }
 0x2da   :  { %v1588_v55 = vpop.f32.mrb[124].mxu1 }
 0x2db   :  { %v1620_v46 = vadd.f32 %v1588_v55, %v1515_v51  ;;  %v3001_v7 = vpop.f32.mrb[125].mxu1 }
 0x2dc   :  { %v1591_v10 = vpop.f32.mrb[126].mxu1 }
 0x2dd   :  { %v1621_v20 = vadd.f32 %v1591_v10, %v1516_v19  ;;  %v3002_v54 = vpop.f32.mrb[127].mxu1 }
 0x2e2   :  { %v1596_v3 = vpop.f32.mrb[128].mxu1 }
 0x2e3   :  { %v1622_v28 = vadd.f32 %v1596_v3, %v1517_v32  ;;  %v3005_v58 = vpop.f32.mrb[129].mxu1 }
 0x2e4   :  { %v1599_v9 = vpop.f32.mrb[130].mxu1 }
 0x2e5   :  { %v1623_v14 = vadd.f32 %v1599_v9, %v1518_v60  ;;  %v3006_v24 = vpop.f32.mrb[131].mxu1 }
 0x2ea   :  { %v1604_v25 = vpop.f32.mrb[132].mxu1 }
 0x2eb   :  { %v1624_v34 = vadd.f32 %v1604_v25, %v1519_v22  ;;  %v3009_v21 = vpop.f32.mrb[133].mxu1 }
 0x2ec   :  { %v1607_v23 = vpop.f32.mrb[134].mxu1 }
 0x2ed   :  { %v1625_v26 = vadd.f32 %v1607_v23, %v1520_v6  ;;  %v3010_v62 = vpop.f32.mrb[135].mxu1  ;;  %v3122_v23 = vld [vmem:[%s4004_s5 + $0x34] ss:$8 sps:$4 sm:$0xff]  }
 0x2f2   :  { %v1612_v29 = vpop.f32.mrb[136].mxu1 }
 0x2f3   :  { %v1626_v42 = vadd.f32 %v1612_v29, %v1521_v53  ;;  %v3013_v12 = vpop.f32.mrb[137].mxu1 }
 0x2f4   :  { %v1615_v33 = vpop.f32.mrb[138].mxu1 }
 0x2f5   :  { %v3014_v44 = vpop.f32.mrb[139].mxu1 }
 0x2f6   :  { %v3123_v44 = vld [vmem:[%s4004_s5 + $0x60] ss:$8 sps:$4 sm:$0xff]  }
 0x2fa   :  { %v1685_v35 = vpop.f32.mrb[140].mxu1 }
 0x2fb   :  { %v1723_v37 = vadd.f32 %v1685_v35, %v1618_v30  ;;  %v3019_v40 = vpop.f32.mrb[141].mxu1  ;;  %v3918_v30 = vld [vmem:[%s4003_s4] ss:$0 sm:$0xff] }
 0x2fc   :  { %v1688_v41 = vpop.f32.mrb[142].mxu1 }
 0x2fd   :  { %v1724_v5 = vadd.f32 %v1688_v41, %v1619_v49  ;;  %v3020_v43 = vpop.f32.mrb[143].mxu1  ;;  %v3120_v41 = vld [vmem:[%s4004_s5 + $0x30] ss:$8 sps:$4 sm:$0xff]  }
 0x302   :  { %v1693_v27 = vpop.f32.mrb[144].mxu1 }
 0x303   :  { %v1725_v48 = vadd.f32 %v1693_v27, %v1620_v46  ;;  %v3023_v36 = vpop.f32.mrb[145].mxu1 }
 0x304   :  { %v1696_v39 = vpop.f32.mrb[146].mxu1  ;;  %v3128_v36 = vld [vmem:[%s4004_s5 + $0x54] ss:$8 sps:$4 sm:$0xff]  }
 0x305   :  { %v1726_v50 = vadd.f32 %v1696_v39, %v1621_v20  ;;  %v3024_v51 = vpop.f32.mrb[147].mxu1  ;;  %v3119_v20 = vld [vmem:[%s4004_s5 + $0x24] ss:$8 sps:$4 sm:$0xff]  }
 0x30a   :  { %v1701_v17 = vpop.f32.mrb[148].mxu1 }
 0x30b   :  { %v1727_v52 = vadd.f32 %v1701_v17, %v1622_v28  ;;  %v3027_v19 = vpop.f32.mrb[149].mxu1 }
 0x30c   :  { %v1704_v4 = vpop.f32.mrb[150].mxu1 }
 0x30d   :  { %v1728_v38 = vadd.f32 %v1704_v4, %v1623_v14  ;;  %v3028_v32 = vpop.f32.mrb[151].mxu1  ;;  %v3117_v14 = vld [vmem:[%s4004_s5 + $0x20] ss:$8 sps:$4 sm:$0xff]  }
 0x30e   :  { %v3129_v4 = vld [vmem:[%s4004_s5 + $0x80] ss:$8 sps:$4 sm:$0xff]  }
 0x312   :  { %v1709_v59 = vpop.f32.mrb[152].mxu1 }
 0x313   :  { %v1729_v13 = vadd.f32 %v1709_v59, %v1624_v34  ;;  %v3031_v60 = vpop.f32.mrb[153].mxu1  ;;  %v3126_v59 = vld [vmem:[%s4004_s5 + $0x50] ss:$8 sps:$4 sm:$0xff]  }
 0x314   :  { %v1712_v61 = vpop.f32.mrb[154].mxu1 }
 0x315   :  { %v3911_v63 = vadd.f32 %v1712_v61, %v1625_v26  ;;  %v3032_v2 = vpop.f32.mrb[155].mxu1 }
 0x316   :  { %v3134_v2 = vld [vmem:[%s4004_s5 + $0x74] ss:$8 sps:$4 sm:$0xff]  }
 0x31a   :  { %v1717_v22 = vpop.f32.mrb[156].mxu1 }
 0x31b   :  { %v3913_v56 = vadd.f32 %v1717_v22, %v1626_v42  ;;  %v3035_v0 = vpop.f32.mrb[157].mxu1 }
 0x31c   :  { %v1720_v6 = vpop.f32.mrb[158].mxu1 }
 0x31d   :  { %v3036_v47 = vpop.f32.mrb[159].mxu1 }
 0x322   :  { %v1790_v8 = vpop.f32.mrb[160].mxu1 }
 0x323   :  { %v1828_v53 = vadd.f32 %v1790_v8, %v1723_v37  ;;  %v3041_v11 = vpop.f32.mrb[161].mxu1  ;;  %v3131_v37 = vld [vmem:[%s4004_s5 + $0x84] ss:$8 sps:$4 sm:$0xff]  }
 0x324   :  { %v1793_v31 = vpop.f32.mrb[162].mxu1 }
 0x325   :  { %v1829_v15 = vadd.f32 %v1793_v31, %v1724_v5  ;;  %v3042_v1 = vpop.f32.mrb[163].mxu1  ;;  %v1844_v55 = vadd.f32 %v3918_v30, %v1828_v53  ;;  %v3132_v53 = vld [vmem:[%s4004_s5 + $0x70] ss:$8 sps:$4 sm:$0xff]  }
 0x327   :  { %v1845_v16 = vadd.f32 %v3918_v30, %v1829_v15  ;;  %v1853_v58 = vmax.f32 %v1844_v55, 0.0 }
 0x329   :  { %v1854_v57 = vmax.f32 %v1845_v16, 0.0  ;;  %v1862_v24 = vpack.c.bf16 %v1853_v58, %v1853_v58 }
 0x32a   :  { %v1798_v49 = vpop.f32.mrb[164].mxu1 }
 0x32b   :  { %v1865_v46 = vpack.c.bf16 %v1854_v57, %v1854_v57  ;;  %v1830_v7 = vadd.f32 %v1798_v49, %v1725_v48  ;;  %v3045_v10 = vpop.f32.mrb[165].mxu1 }
 0x32c   :  { %v1801_v54 = vpop.f32.mrb[166].mxu1 }
 0x32d   :  { %v1831_v3 = vadd.f32 %v1801_v54, %v1726_v50  ;;  %2568 = vmatmul.mubr.msk.bf16.vlgmr.msra.gmra.mrb[164].mxu0 %vm1878_vm5, %v1865_v46  ;;  %v3046_v28 = vpop.f32.mrb[167].mxu1  ;;  %v1846_v25 = vadd.f32 %v3918_v30, %v1830_v7 }
 0x32e   :  { %1937 = vmatpush1.bf16.msra.mxu0 %v3114_v18  ;;  %1968 = vmatprep.mubr.bf16.mxu0 %v3162_v45 }
 0x32f   :  { %1993 = vmatprep.subr.bf16.mxu0 %v3119_v20  ;;  %v1855_v12 = vmax.f32 %v1846_v25, 0.0  ;;  %v1847_v43 = vadd.f32 %v3918_v30, %v1831_v3 }
 0x331   :  { %v1977_v5 = vpack.c.bf16 %v1855_v12, %v1855_v12 }
 0x332   :  { %v1806_v9 = vpop.f32.mrb[168].mxu1 }
 0x333   :  { %v1832_v34 = vadd.f32 %v1806_v9, %v1727_v52  ;;  %v3049_v21 = vpop.f32.mrb[169].mxu1  ;;  %v1856_v52 = vmax.f32 %v1847_v43, 0.0 }
 0x334   :  { %v1809_v26 = vpop.f32.mrb[170].mxu1 }
 0x335   :  { %v1848_v62 = vadd.f32 %v3918_v30, %v1832_v34  ;;  %v1833_v29 = vadd.f32 %v1809_v26, %v1728_v38  ;;  %2571 = vmatmul.mubr.msk.bf16.vlgmr.msra.gmra.mrb[168].mxu0 %vm1878_vm5, %v1862_v24  ;;  %v3050_v42 = vpop.f32.mrb[171].mxu1 }
 0x336   :  { %1994 = vmatpush1.bf16.msra.mxu0 %v3117_v14  ;;  %2025 = vmatprep.mubr.bf16.mxu0 %v3162_v45 }
 0x337   :  { %v1857_v33 = vmax.f32 %v1848_v62, 0.0  ;;  %2052 = vmatprep.subr.bf16.mxu0 %v3122_v23  ;;  %v1849_v60 = vadd.f32 %v3918_v30, %v1833_v29 }
 0x339   :  { %v2095_v35 = vpack.c.bf16 %v1857_v33, %v1857_v33 }
 0x33a   :  { %v1814_v40 = vpop.f32.mrb[172].mxu1 }
 0x33b   :  { %v1834_v27 = vadd.f32 %v1814_v40, %v1729_v13  ;;  %v3053_v48 = vpop.f32.mrb[173].mxu1  ;;  %2580 = vmatmul.mubr.msk.bf16.vlgmr.msra.gmra.mrb[180].mxu1 %vm1878_vm5, %v2095_v35  ;;  %v2036_v13 = vpack.c.bf16 %v1856_v52, %v1856_v52 }
 0x33c   :  { %v1817_v39 = vpop.f32.mrb[174].mxu1  ;;  %2230 = vmatpush1.bf16.msra.mxu1 %v3123_v44  ;;  %2261 = vmatprep.mubr.bf16.mxu1 %v3162_v45 }
 0x33d   :  { %v1850_v50 = vadd.f32 %v3918_v30, %v1834_v27  ;;  %v1835_v51 = vadd.f32 %v1817_v39, %v3911_v63  ;;  %2574 = vmatmul.mubr.msk.bf16.vlgmr.msra.gmra.mrb[172].mxu0 %vm1878_vm5, %v1977_v5  ;;  %v3054_v17 = vpop.f32.mrb[175].mxu1  ;;  %2347 = vmatprep.subr.bf16.mxu1 %v3131_v37 }
 0x33e   :  { %2053 = vmatpush1.bf16.msra.mxu0 %v3120_v41  ;;  %2084 = vmatprep.mubr.bf16.mxu0 %v3162_v45  ;;  %v2392_v41 = vlaneseq }
 0x33f   :  { %v1859_v19 = vmax.f32 %v1850_v50, 0.0  ;;  %2170 = vmatprep.subr.bf16.mxu0 %v3128_v36  ;;  %v1851_v31 = vadd.f32 %v3918_v30, %v1835_v51 }
 0x340   :  { %v2393_v51 = vshrl.u32 %v2392_v41, 7 }
 0x341   :  { %v2213_v38 = vpack.c.bf16 %v1859_v19, %v1859_v19  ;;  %v1860_v15 = vmax.f32 %v1851_v31, 0.0 }
 0x342   :  { %v1822_v32 = vpop.f32.mrb[176].mxu1 }
 0x343   :  { %v1836_v61 = vadd.f32 %v1822_v32, %v3913_v56  ;;  %2586 = vmatmul.mubr.msk.bf16.vlgmr.msra.gmra.mrb[184].mxu1 %vm1878_vm5, %v2213_v38  ;;  %v3057_v63 = vpop.f32.mrb[177].mxu1  ;;  %v1858_v56 = vmax.f32 %v1849_v60, 0.0  ;;  %v2272_v1 = vpack.c.bf16 %v1860_v15, %v1860_v15  ;;  %v2394_v32 = vsub.s32 0, %v2393_v51 }
 0x344   :  { %2348 = vmatpush1.bf16.msra.mxu1 %v3129_v4  ;;  %2379 = vmatprep.mubr.bf16.mxu1 %v3162_v45  ;;  %v1825_v22 = vpop.f32.mrb[178].mxu1 }
 0x345   :  { %v1852_v0 = vadd.f32 %v3918_v30, %v1836_v61  ;;  %2577 = vmatmul.mubr.msk.bf16.vlgmr.msra.gmra.mrb[176].mxu0 %vm1878_vm5, %v2036_v13  ;;  %v3058_v6 = vpop.f32.mrb[179].mxu1  ;;  %v2154_v11 = vpack.c.bf16 %v1858_v56, %v1858_v56  ;;  %v2398_v13 = vsub.s32 1, %v2393_v51  ;;  %v3163_v61 = vmov 1983009808  }
 0x346   :  { %2171 = vmatpush1.bf16.msra.mxu0 %v3126_v59  ;;  %2202 = vmatprep.mubr.bf16.mxu0 %v3162_v45  ;;  %v2390_v59 = vld [vmem:[%s4005_s6] sm:$0x3]  ;;  %v2410_v63 = vunpack.c.l.s4 %v3163_v61  ;;  %s3164_s6 = smov [#allocation2]  }
 0x347   :  { %v1861_v47 = vmax.f32 %v1852_v0, 0.0  ;;  %2288 = vmatprep.subr.bf16.mxu0 %v3134_v2  ;;  %v2395_v22 = vrot.slane %v2390_v59, %v2394_v32  ;;  %v2399_v56 = vrot.slane %v2390_v59, %v2398_v13  ;;  %s2426_s22 = sshll.u32 %s3164_s6, 4  ;;  %s2427_s22 = int_to_ptr.vmem [resolvable:$true] %s2426_s22 }
 0x348   :  { %v2411_v31 = vunpack.c.0.s8 %v2410_v63  ;;  %s3136_s23 = scalar_lea.vmem %s2427_s22, 64  ;;  %p3141_p1 = scmp.lt.s32.totalorder %s2427_s22, %s2427_s22 }
 0x349   :  { %v2331_v8 = vpack.c.bf16 %v1861_v47, %v1861_v47  ;;  %p3137_p0 = scmp.ne.s32.totalorder %s2427_s22, %s3136_s23  ;;  %p3142_p2 = scmp.lt.s32.totalorder %s3136_s23, %s3136_s23 }
 0x34b   :  { %2592 = vmatmul.mubr.msk.bf16.vlgmr.msra.gmra.mrb[188].mxu1 %vm1878_vm5, %v2331_v8  ;;  %p3143_p3 = por %p3142_p2, %p3141_p1 }
 0x34d   :  { %2583 = vmatmul.mubr.msk.bf16.vlgmr.msra.gmra.mrb[180].mxu0 %vm1878_vm5, %v2154_v11  ;;  %p3144_p4 = pnand %p3143_p3, %p3137_p0 }
 0x34e   :  { %2289 = vmatpush1.bf16.msra.mxu0 %v3132_v53  ;;  %2320 = vmatprep.mubr.bf16.mxu0 %v3162_v45 }
 0x355   :  { %2589 = vmatmul.mubr.msk.bf16.vlgmr.msra.gmra.mrb[184].mxu0 %vm1878_vm5, %v2272_v1 }
 0x400   :  { %v1916_v16 = vpop.f32.mrb[164].mxu0 }
 0x401   :  { %v1918_v57 = vpop.f32.mrb[165].mxu0 }
 0x402   :  { %v1920_v49 = vpop.f32.mrb[166].mxu0 }
 0x403   :  { %v1921_v18 = vpop.f32.mrb[167].mxu0  ;;  %v2414_v49 = vsub.s32 %v2411_v31, %v2393_v51 }
 0x408   :  { %v1970_v55 = vpop.f32.mrb[168].mxu0 }
 0x409   :  { %v1971_v46 = vadd.f32 %v1970_v55, %v1916_v16  ;;  %v1972_v7 = vpop.f32.mrb[169].mxu0 }
 0x40a   :  { %v1973_v10 = vadd.f32 %v1972_v7, %v1918_v57  ;;  %v1974_v30 = vpop.f32.mrb[170].mxu0 }
 0x40b   :  { %v1975_v20 = vpop.f32.mrb[171].mxu0 }
 0x40e   :  { %v2145_v54 = vpop.f32.mrb[180].mxu1 }
 0x40f   :  { %v2147_v3 = vpop.f32.mrb[181].mxu1 }
 0x410   :  { %v2027_v28 = vpop.f32.mrb[172].mxu0  ;;  %v2149_v58 = vpop.f32.mrb[182].mxu1 }
 0x411   :  { %v2034_v9 = vadd.f32 %v2027_v28, %v1971_v46  ;;  %v2029_v45 = vpop.f32.mrb[173].mxu0  ;;  %v2150_v14 = vpop.f32.mrb[183].mxu1 }
 0x412   :  { %v2035_v24 = vadd.f32 %v2029_v45, %v1973_v10  ;;  %v2031_v25 = vpop.f32.mrb[174].mxu0 }
 0x413   :  { %v2032_v34 = vpop.f32.mrb[175].mxu0 }
 0x416   :  { %v2263_v21 = vpop.f32.mrb[184].mxu1 }
 0x417   :  { %v2265_v23 = vpop.f32.mrb[185].mxu1 }
 0x418   :  { %v2086_v26 = vpop.f32.mrb[176].mxu0  ;;  %v2267_v62 = vpop.f32.mrb[186].mxu1 }
 0x419   :  { %v2093_v29 = vadd.f32 %v2086_v26, %v2034_v9  ;;  %v2088_v42 = vpop.f32.mrb[177].mxu0  ;;  %v2268_v12 = vpop.f32.mrb[187].mxu1 }
 0x41a   :  { %v2094_v33 = vadd.f32 %v2088_v42, %v2035_v24  ;;  %v2090_v44 = vpop.f32.mrb[178].mxu0 }
 0x41b   :  { %v2091_v35 = vpop.f32.mrb[179].mxu0  ;;  %v2152_v37 = vadd.f32 %v2145_v54, %v2093_v29 }
 0x41c   :  { %v2153_v40 = vadd.f32 %v2147_v3, %v2094_v33 }
 0x41e   :  { %v2381_v5 = vpop.f32.mrb[188].mxu1 }
 0x41f   :  { %v2383_v43 = vpop.f32.mrb[189].mxu1 }
 0x420   :  { %v2204_v27 = vpop.f32.mrb[180].mxu0  ;;  %v2385_v48 = vpop.f32.mrb[190].mxu1 }
 0x421   :  { %v2211_v36 = vadd.f32 %v2204_v27, %v2152_v37  ;;  %v2206_v39 = vpop.f32.mrb[181].mxu0  ;;  %v2386_v50 = vpop.f32.mrb[191].mxu1 }
 0x422   :  { %v2212_v17 = vadd.f32 %v2206_v39, %v2153_v40  ;;  %v2208_v52 = vpop.f32.mrb[182].mxu0 }
 0x423   :  { %v2209_v19 = vpop.f32.mrb[183].mxu0  ;;  %v2270_v4 = vadd.f32 %v2263_v21, %v2211_v36 }
 0x424   :  { %v2271_v38 = vadd.f32 %v2265_v23, %v2212_v17 }
 0x428   :  { %v2322_v60 = vpop.f32.mrb[184].mxu0 }
 0x429   :  { %v2329_v2 = vadd.f32 %v2322_v60, %v2270_v4  ;;  %v2324_v0 = vpop.f32.mrb[185].mxu0 }
 0x42a   :  { %v2330_v6 = vadd.f32 %v2324_v0, %v2271_v38  ;;  %v2326_v47 = vpop.f32.mrb[186].mxu0 }
 0x42b   :  { %v2388_v8 = vadd.f32 %v2381_v5, %v2329_v2  ;;  %v2327_v53 = vpop.f32.mrb[187].mxu0 }
 0x42c   :  { %v2389_v11 = vadd.f32 %v2383_v43, %v2330_v6 }
 0x42d   :  { %v2402_v15 = vadd.f32 %v2395_v22, %v2388_v8 }
 0x42e   :  { %v2403_v1 = vadd.f32 %v2399_v56, %v2389_v11 }
 0x42f   :  { %v2404_v16 = vmax.f32 %v2402_v15, 0.0 }
 0x430   :  { %v2405_v57 = vmax.f32 %v2403_v1, 0.0 }
 0x432   :  { %v2408_v18 = vcombine.low %v2404_v16, %v2405_v57 }
 0x434   :  { %v2415_v55 = vrot.slane %v2408_v18, %v2414_v49 }
 0x436   :  { %2419 = vst.msk [vmem:[#allocation2] sm:$0xf] %vm2418_vm7, %v2415_v55 }
 0x437   :  { %3147 = shalt.err (!%p3144_p4)
}
 0x438   :  { %s3148_s25 = scalar_lea.hbm %s4006_s7, 64 }
 0x439   :  { %p3149_p5 = scmp.ne.s32.totalorder %s4006_s7, %s3148_s25  ;;  %p3152_p6 = scmp.lt.u32.totalorder %s3148_s25, %s4006_s7 }
 0x43b   :  { %p3154_p7 = pnand %p3152_p6, %p3149_p5 }
 0x43d   :  { %3157 = shalt.err (!%p3154_p7)
}
 0x43e   :  { %2429 = dma.vmem_to_hbm [thread:$0]  %s2427_s22, 64, %s4006_s7, [#allocation3]  }
 0x43f   :  { %3158 = dma.done.wait [#allocation3], 64  }
 0x440   :  { %3159 = vsyncadd [#allocation3], 4294967232 }
 0x441   :  { %2433 = vsyncpa [#allocation3], 1 }

</bundles_post_ra>
